<compile_context>
chip_gen: v5e
topology: v5e:2x2
jax: 0.10.0
libtpu: 0.0.40
codegen_flags: <defaults>
</compile_context>

<pallas_src>
import functools

import jax
import jax.numpy as jnp
from jax import lax
from jax.experimental import pallas as pl
from jax.experimental.pallas import tpu as pltpu
import numpy as np

BN_EPS = 0.001


def _round_up(x, m):
    return (x + m - 1) // m * m


def _lane_alignment(cout):
    """Cout lane padding: 256 on v6e/v7x (2x256^2 MXU) for wide layers, else 128."""
    try:
        kind = jax.devices()[0].device_kind.lower()
    except Exception:
        kind = ""
    if cout > 128 and ("v6" in kind or "v7" in kind):
        return 256
    return 128


# ---------------------------------------------------------------------------
# In-kernel conv: KH shifted row-slices of the per-image width-window block,
# each feeding one (M_img, KW*Cin) x (KW*Cin, CoutP) MXU matmul (f32 acc).
# ---------------------------------------------------------------------------
def _conv_from_taps(a_ref, w_ref, tap_offsets, m_img):
    conv = None
    for i, off in enumerate(tap_offsets):
        lhs = a_ref[off:off + m_img, :]                       # (M_img, KW*Cin) bf16
        part = jnp.dot(lhs, w_ref[i], preferred_element_type=jnp.float32)
        conv = part if conv is None else conv + part
    return conv                                               # (M_img, CoutP) f32


# ---------------------------------------------------------------------------
# Pass 1 (bf16-intermediate mode): conv + bf16 store + per-channel sum / sumsq
# accumulated into a per-core resident block (VPU/XLU reduction, not MXU).
# ---------------------------------------------------------------------------
def _p1_store_kernel(tap_offsets, m_img, a_ref, w_ref, conv_ref, sum_ref, sq_ref):
    @pl.when(pl.program_id(1) == 0)
    def _():
        sum_ref[...] = jnp.zeros_like(sum_ref)
        sq_ref[...] = jnp.zeros_like(sq_ref)

    conv = _conv_from_taps(a_ref, w_ref, tap_offsets, m_img)
    convb = conv.astype(jnp.bfloat16)
    conv_ref[...] = convb
    # Stats from the *stored* (bf16-rounded) values so normalization is
    # self-consistent with what pass 2 reads back.
    c = convb.astype(jnp.float32)
    sum_ref[0:1, :] += jnp.sum(c, axis=0, keepdims=True)
    sq_ref[0:1, :] += jnp.sum(c * c, axis=0, keepdims=True)


# ---------------------------------------------------------------------------
# Pass 1 (recompute mode): conv + stats only (no intermediate store).
# ---------------------------------------------------------------------------
def _p1_recompute_kernel(tap_offsets, m_img, a_ref, w_ref, sum_ref, sq_ref):
    @pl.when(pl.program_id(1) == 0)
    def _():
        sum_ref[...] = jnp.zeros_like(sum_ref)
        sq_ref[...] = jnp.zeros_like(sq_ref)

    conv = _conv_from_taps(a_ref, w_ref, tap_offsets, m_img)
    sum_ref[0:1, :] += jnp.sum(conv, axis=0, keepdims=True)
    sq_ref[0:1, :] += jnp.sum(conv * conv, axis=0, keepdims=True)


# ---------------------------------------------------------------------------
# Pass 2 (intermediate mode): pure elementwise scale/shift + ReLU on bf16 conv.
# ---------------------------------------------------------------------------
def _p2_elementwise_kernel(conv_ref, scale_ref, shift_ref, o_ref):
    y = conv_ref[...].astype(jnp.float32) * scale_ref[...] + shift_ref[...]
    o_ref[...] = jnp.maximum(y, 0.0).astype(o_ref.dtype)


# ---------------------------------------------------------------------------
# Pass 2 (recompute mode): redo the (bit-identical) tap matmuls + BN + ReLU.
# ---------------------------------------------------------------------------
def _p2_recompute_kernel(tap_offsets, m_img, a_ref, w_ref, scale_ref, shift_ref, o_ref):
    conv = _conv_from_taps(a_ref, w_ref, tap_offsets, m_img)
    y = conv * scale_ref[...] + shift_ref[...]
    o_ref[...] = jnp.maximum(y, 0.0).astype(o_ref.dtype)


@functools.partial(jax.jit, static_argnames=("stride", "padding"))
def basic_conv2d(x_nchw, weight, bias, gamma, beta, *, stride, padding):
    """Forward of BasicConv2d. x_nchw: (N, Cin, H, W), weight: (Cout, Cin, KH, KW)."""
    n, cin, h, w = x_nchw.shape
    cout, _, kh, kw = weight.shape
    s, p = stride, padding
    del bias  # cancels exactly under training-mode BatchNorm

    oh = (h + 2 * p - kh) // s + 1
    ow = (w + 2 * p - kw) // s + 1
    m_img = oh * ow
    m_total = n * m_img
    kwc = kw * cin
    hp = h + 2 * p

    coutp = _round_up(cout, _lane_alignment(cout))

    # ---- layout / patch prep (NHWC, bf16, width window only: ~KW x input) ----
    # NCHW<->NHWC transposes kept only because the module boundary is NCHW; a
    # chained NHWC network would drop both.
    x_nhwc = jnp.transpose(x_nchw, (0, 2, 3, 1)).astype(jnp.bfloat16)
    xp = jnp.pad(x_nhwc, ((0, 0), (p, p), (p, p), (0, 0)))
    cols = [xp[:, :, j:j + (ow - 1) * s + 1:s, :] for j in range(kw)]
    a_w = jnp.concatenate(cols, axis=-1)                      # (N, HP, OW, KW*Cin)

    # Regroup padded rows by residue class mod stride so every height tap maps
    # to a *contiguous* row range of the flattened per-image block.
    if s > 1:
        order = np.concatenate([np.arange(r, hp, s) for r in range(s)])
        a_w = jnp.take(a_w, jnp.asarray(order), axis=1)
        class_sizes = [len(range(r, hp, s)) for r in range(s)]
    else:
        class_sizes = [hp]
    class_start = np.concatenate([[0], np.cumsum(class_sizes)])[:s]
    tap_offsets = tuple(int((class_start[i % s] + i // s) * ow) for i in range(kh))

    a_flat = a_w.reshape(n, hp * ow, kwc)                     # (N, HP*OW, KW*Cin)

    # Weights as (KH, KW*Cin, CoutP), channel fastest along K, bf16, lane-dense.
    w_taps = jnp.transpose(weight, (2, 3, 1, 0)).reshape(kh, kwc, cout)
    w_taps = jnp.pad(w_taps, ((0, 0), (0, 0), (0, coutp - cout))).astype(jnp.bfloat16)

    # Per-layer choice: bf16 intermediate (large K) vs conv recompute (small K).
    use_intermediate = (2 * coutp) <= kwc

    # Megacore split of pass 1 over images (explicit parallel axis; the M/stat
    # axis must stay "arbitrary" because of the resident stat accumulators).
    ncores = 2 if (n % 2 == 0 and n >= 2) else 1
    per_core = n // ncores

    # ---- explicit VMEM budget -> vmem_limit_bytes ----------------------------
    a_bytes = hp * ow * kwc * 2
    w_bytes = kh * kwc * coutp * 2
    convb_bytes = m_img * coutp * 2
    convf_bytes = m_img * coutp * 4        # in-kernel f32 conv temporary (spill)
    stat_bytes = 2 * 8 * coutp * 4
    est = (2 * a_bytes + 2 * w_bytes + stat_bytes + 2 * convf_bytes
           + (2 * convb_bytes if use_intermediate else 0)
           + 2 * m_img * coutp * 4)        # pass-2 f32 output block (double buffered)
    vmem_limit = int(min(max(2 * est + (4 << 20), 32 << 20), 64 << 20))

    params_p1 = pltpu.CompilerParams(
        dimension_semantics=("parallel", "arbitrary"), vmem_limit_bytes=vmem_limit)
    params_p2 = pltpu.CompilerParams(
        dimension_semantics=("parallel",), vmem_limit_bytes=vmem_limit)

    a_spec_p1 = pl.BlockSpec((None, hp * ow, kwc),
                             lambda c, t: (c * per_core + t, 0, 0))
    w_spec_p1 = pl.BlockSpec((kh, kwc, coutp), lambda c, t: (0, 0, 0))
    stat_spec = pl.BlockSpec((None, 8, coutp), lambda c, t: (c, 0, 0))
    stat_shape = jax.ShapeDtypeStruct((ncores, 8, coutp), jnp.float32)

    matmul_flops = 2 * n * m_img * kh * kwc * coutp

    # ---------------- pass 1: conv (+ optional bf16 store) + batch stats ------
    if use_intermediate:
        kernel1 = functools.partial(_p1_store_kernel, tap_offsets, m_img)
        conv_spec = pl.BlockSpec((None, m_img, coutp),
                                 lambda c, t: (c * per_core + t, 0, 0))
        out_shape1 = (jax.ShapeDtypeStruct((n, m_img, coutp), jnp.bfloat16),
                      stat_shape, stat_shape)
        out_specs1 = [conv_spec, stat_spec, stat_spec]
        bytes1 = n * a_bytes + w_bytes + n * convb_bytes + 2 * ncores * 8 * coutp * 4
    else:
        kernel1 = functools.partial(_p1_recompute_kernel, tap_offsets, m_img)
        out_shape1 = (stat_shape, stat_shape)
        out_specs1 = [stat_spec, stat_spec]
        bytes1 = n * a_bytes + w_bytes + 2 * ncores * 8 * coutp * 4

    res1 = pl.pallas_call(
        kernel1,
        out_shape=out_shape1,
        grid_spec=pltpu.PrefetchScalarGridSpec(
            num_scalar_prefetch=0,
            grid=(ncores, per_core),
            in_specs=[a_spec_p1, w_spec_p1],
            out_specs=out_specs1),
        compiler_params=params_p1,
        cost_estimate=pl.CostEstimate(flops=matmul_flops + 4 * m_total * coutp,
                                      transcendentals=0, bytes_accessed=bytes1),
    )(a_flat, w_taps)

    if use_intermediate:
        convb, sums, sqs = res1
    else:
        sums, sqs = res1

    # ---- tiny per-channel combine (f32, plain JAX) ---------------------------
    csum = jnp.sum(sums[:, 0, :], axis=0)
    csq = jnp.sum(sqs[:, 0, :], axis=0)
    mean = csum / m_total                       # biased (training-mode) statistics
    # TODO(synk): E[x^2]-E[x]^2 cancels when |mean| >> std; switch to a shifted /
    # Welford-style combine if that regime shows up in practice.
    var = jnp.maximum(csq / m_total - mean * mean, 0.0)
    inv_std = lax.rsqrt(var + BN_EPS)
    gamma_p = jnp.pad(gamma.astype(jnp.float32), (0, coutp - cout))
    beta_p = jnp.pad(beta.astype(jnp.float32), (0, coutp - cout))
    scale = (gamma_p * inv_std).reshape(1, coutp)
    shift = (beta_p - mean * gamma_p * inv_std).reshape(1, coutp)

    # ---------------- pass 2: normalize + ReLU --------------------------------
    vec_spec = pl.BlockSpec((1, coutp), lambda i: (0, 0))
    y_spec = pl.BlockSpec((None, m_img, coutp), lambda i: (i, 0, 0))
    out_shape2 = jax.ShapeDtypeStruct((n, m_img, coutp), jnp.float32)

    if use_intermediate:
        y = pl.pallas_call(
            _p2_elementwise_kernel,
            out_shape=out_shape2,
            grid_spec=pltpu.PrefetchScalarGridSpec(
                num_scalar_prefetch=0, grid=(n,),
                in_specs=[pl.BlockSpec((None, m_img, coutp), lambda i: (i, 0, 0)),
                          vec_spec, vec_spec],
                out_specs=y_spec),
            compiler_params=params_p2,
            cost_estimate=pl.CostEstimate(
                flops=3 * m_total * coutp, transcendentals=0,
                bytes_accessed=n * convb_bytes + n * m_img * coutp * 4),
        )(convb, scale, shift)
    else:
        kernel2 = functools.partial(_p2_recompute_kernel, tap_offsets, m_img)
        y = pl.pallas_call(
            kernel2,
            out_shape=out_shape2,
            grid_spec=pltpu.PrefetchScalarGridSpec(
                num_scalar_prefetch=0, grid=(n,),
                in_specs=[pl.BlockSpec((None, hp * ow, kwc), lambda i: (i, 0, 0)),
                          pl.BlockSpec((kh, kwc, coutp), lambda i: (0, 0, 0)),
                          vec_spec, vec_spec],
                out_specs=y_spec),
            compiler_params=params_p2,
            cost_estimate=pl.CostEstimate(
                flops=matmul_flops + 3 * m_total * coutp, transcendentals=0,
                bytes_accessed=n * a_bytes + w_bytes + n * m_img * coutp * 4),
        )(a_flat, w_taps, scale, shift)

    out_nhwc = y[:, :, :cout].reshape(n, oh, ow, cout)
    return jnp.transpose(out_nhwc, (0, 3, 1, 2))              # NCHW at the boundary


def _reference(x_nchw, weight, bias, gamma, beta, stride, padding):
    """Plain-JAX reference (lax conv + training-mode BN + ReLU) for validation."""
    conv = lax.conv_general_dilated(
        x_nchw, weight,
        window_strides=(stride, stride),
        padding=[(padding, padding), (padding, padding)],
        dimension_numbers=("NCHW", "OIHW", "NCHW"),
    ) + bias.reshape(1, -1, 1, 1)
    mean = jnp.mean(conv, axis=(0, 2, 3), keepdims=True)
    var = jnp.mean((conv - mean) ** 2, axis=(0, 2, 3), keepdims=True)
    y = gamma.reshape(1, -1, 1, 1) * (conv - mean) * lax.rsqrt(var + BN_EPS) \
        + beta.reshape(1, -1, 1, 1)
    return jnp.maximum(y, 0.0)


def _run_case(name, key, n, cin, h, w, cout, ksize, stride, padding):
    kx, kw_, kb, kg, kbe = jax.random.split(key, 5)
    x = jax.random.normal(kx, (n, cin, h, w), dtype=jnp.float32)
    weight = jax.random.normal(kw_, (cout, cin, ksize, ksize), dtype=jnp.float32) * 0.1
    bias = jax.random.normal(kb, (cout,), dtype=jnp.float32) * 0.1
    gamma = 1.0 + 0.1 * jax.random.normal(kg, (cout,), dtype=jnp.float32)
    beta = 0.1 * jax.random.normal(kbe, (cout,), dtype=jnp.float32)

    out = basic_conv2d(x, weight, bias, gamma, beta, stride=stride, padding=padding)
    out = jax.block_until_ready(out)
    ref = _reference(x, weight, bias, gamma, beta, stride, padding)
    np.testing.assert_allclose(np.asarray(out), np.asarray(ref),
                               rtol=5e-2, atol=5e-2, err_msg=name)


if __name__ == "__main__":
    key = jax.random.PRNGKey(0)
    k1, k2, k3 = jax.random.split(key, 3)
    # small-K layer -> conv-recompute path
    _run_case("recompute", k1, 2, 4, 16, 16, 8, 3, 1, 1)
    # large-K layer -> bf16-intermediate + elementwise pass-2 path
    _run_case("intermediate", k2, 2, 96, 8, 8, 16, 3, 1, 1)
    # strided conv -> residue-class row regrouping
    _run_case("strided", k3, 1, 8, 15, 15, 8, 3, 2, 1)
    print("KERNEL_OK")
</pallas_src>

<mosaic_0001>
module attributes {stable_mosaic.version = 11 : i64} {
  func.func @_p1_recompute_kernel(%arg0: i32, %arg1: i32, %arg2: memref<1x288x12xbf16, #tpu.memory_space<vmem>>, %arg3: memref<3x12x128xbf16, #tpu.memory_space<vmem>>, %arg4: memref<1x8x128xf32, #tpu.memory_space<vmem>>, %arg5: memref<1x8x128xf32, #tpu.memory_space<vmem>>) attributes {dimension_semantics = [#tpu.dimension_semantics<parallel>, #tpu.dimension_semantics<arbitrary>], iteration_bounds = array<i64: 2, 1>, scalar_prefetch = 0 : i64, scratch_operands = 0 : i64, tpu.core_type = #tpu.core_type<tc>, window_params = [{transform_indices = @transform_0, window_bounds = array<i64: 1, 288, 12>}, {pipeline_mode = #tpu.pipeline_mode<synchronous>, transform_indices = @transform_1, window_bounds = array<i64: 3, 12, 128>}, {transform_indices = @transform_2, window_bounds = array<i64: 1, 8, 128>}, {transform_indices = @transform_3, window_bounds = array<i64: 1, 8, 128>}]} {
    %c0_i32 = arith.constant 0 : i32
    %0 = arith.cmpi eq, %arg1, %c0_i32 : i32
    %1 = arith.extui %0 : i1 to i32
    %c0_i32_0 = arith.constant 0 : i32
    %2 = arith.cmpi ne, %1, %c0_i32_0 : i32
    scf.if %2 {
      %cst_30 = arith.constant 0.000000e+00 : f32
      %37 = vector.broadcast %cst_30 : f32 to vector<8x128xf32>
      %c0_31 = arith.constant 0 : index
      %c0_32 = arith.constant 0 : index
      %c0_33 = arith.constant 0 : index
      %38 = vector.load %arg4[%c0_31, %c0_32, %c0_33] : memref<1x8x128xf32, #tpu.memory_space<vmem>>, vector<1x8x128xf32>
      %39 = vector.shape_cast %38 : vector<1x8x128xf32> to vector<8x128xf32>
      %40 = vector.shape_cast %37 : vector<8x128xf32> to vector<1x8x128xf32>
      tpu.vector_store %arg4[%c0_31, %c0_32, %c0_33], %40 {strides = array<i32>} : memref<1x8x128xf32, #tpu.memory_space<vmem>>, vector<1x8x128xf32>,
      %cst_34 = arith.constant 0.000000e+00 : f32
      %41 = vector.broadcast %cst_34 : f32 to vector<8x128xf32>
      %c0_35 = arith.constant 0 : index
      %c0_36 = arith.constant 0 : index
      %c0_37 = arith.constant 0 : index
      %42 = vector.load %arg5[%c0_35, %c0_36, %c0_37] : memref<1x8x128xf32, #tpu.memory_space<vmem>>, vector<1x8x128xf32>
      %43 = vector.shape_cast %42 : vector<1x8x128xf32> to vector<8x128xf32>
      %44 = vector.shape_cast %41 : vector<8x128xf32> to vector<1x8x128xf32>
      tpu.vector_store %arg5[%c0_35, %c0_36, %c0_37], %44 {strides = array<i32>} : memref<1x8x128xf32, #tpu.memory_space<vmem>>, vector<1x8x128xf32>,
    } else {
    }
    %c0 = arith.constant 0 : index
    %c0_1 = arith.constant 0 : index
    %c0_2 = arith.constant 0 : index
    %3 = vector.load %arg2[%c0, %c0_1, %c0_2] : memref<1x288x12xbf16, #tpu.memory_space<vmem>>, vector<1x256x12xbf16>
    %4 = vector.shape_cast %3 : vector<1x256x12xbf16> to vector<256x12xbf16>
    %c0_3 = arith.constant 0 : index
    %c0_4 = arith.constant 0 : index
    %c0_5 = arith.constant 0 : index
    %5 = vector.load %arg3[%c0_3, %c0_4, %c0_5] : memref<3x12x128xbf16, #tpu.memory_space<vmem>>, vector<1x12x128xbf16>
    %6 = vector.shape_cast %5 : vector<1x12x128xbf16> to vector<12x128xbf16>
    %cst = arith.constant dense<0.000000e+00> : vector<256x128xf32>
    %7 = tpu.matmul %4, %6, %cst {dimension_numbers = #tpu.dot_dimension_numbers<[1], [0], [0], [1], [0, 0, 1, 1], [], []>} : vector<256x12xbf16>, vector<12x128xbf16>, vector<256x128xf32> -> vector<256x128xf32>
    %c0_6 = arith.constant 0 : index
    %c16 = arith.constant 16 : index
    %c0_7 = arith.constant 0 : index
    %8 = vector.load %arg2[%c0_6, %c16, %c0_7] : memref<1x288x12xbf16, #tpu.memory_space<vmem>>, vector<1x256x12xbf16>
    %9 = vector.shape_cast %8 : vector<1x256x12xbf16> to vector<256x12xbf16>
    %c1 = arith.constant 1 : index
    %c0_8 = arith.constant 0 : index
    %c0_9 = arith.constant 0 : index
    %10 = vector.load %arg3[%c1, %c0_8, %c0_9] : memref<3x12x128xbf16, #tpu.memory_space<vmem>>, vector<1x12x128xbf16>
    %11 = vector.shape_cast %10 : vector<1x12x128xbf16> to vector<12x128xbf16>
    %cst_10 = arith.constant dense<0.000000e+00> : vector<256x128xf32>
    %12 = tpu.matmul %9, %11, %cst_10 {dimension_numbers = #tpu.dot_dimension_numbers<[1], [0], [0], [1], [0, 0, 1, 1], [], []>} : vector<256x12xbf16>, vector<12x128xbf16>, vector<256x128xf32> -> vector<256x128xf32>
    %13 = arith.addf %7, %12 : vector<256x128xf32>
    %c0_11 = arith.constant 0 : index
    %c32 = arith.constant 32 : index
    %c0_12 = arith.constant 0 : index
    %14 = vector.load %arg2[%c0_11, %c32, %c0_12] : memref<1x288x12xbf16, #tpu.memory_space<vmem>>, vector<1x256x12xbf16>
    %15 = vector.shape_cast %14 : vector<1x256x12xbf16> to vector<256x12xbf16>
    %c2 = arith.constant 2 : index
    %c0_13 = arith.constant 0 : index
    %c0_14 = arith.constant 0 : index
    %16 = vector.load %arg3[%c2, %c0_13, %c0_14] : memref<3x12x128xbf16, #tpu.memory_space<vmem>>, vector<1x12x128xbf16>
    %17 = vector.shape_cast %16 : vector<1x12x128xbf16> to vector<12x128xbf16>
    %cst_15 = arith.constant dense<0.000000e+00> : vector<256x128xf32>
    %18 = tpu.matmul %15, %17, %cst_15 {dimension_numbers = #tpu.dot_dimension_numbers<[1], [0], [0], [1], [0, 0, 1, 1], [], []>} : vector<256x12xbf16>, vector<12x128xbf16>, vector<256x128xf32> -> vector<256x128xf32>
    %19 = arith.addf %13, %18 : vector<256x128xf32>
    %c0_16 = arith.constant 0 : index
    %c0_17 = arith.constant 0 : index
    %c0_18 = arith.constant 0 : index
    %20 = vector.load %arg4[%c0_16, %c0_17, %c0_18] : memref<1x8x128xf32, #tpu.memory_space<vmem>>, vector<1x1x128xf32>
    %21 = vector.shape_cast %20 : vector<1x1x128xf32> to vector<1x128xf32>
    %cst_19 = arith.constant dense<0.000000e+00> : vector<128xf32>
    %22 = vector.multi_reduction <add>, %19, %cst_19 [0] : vector<256x128xf32> to vector<128xf32>
    %23 = vector.shape_cast %22 : vector<128xf32> to vector<1x128xf32>
    %24 = arith.addf %21, %23 : vector<1x128xf32>
    %c0_20 = arith.constant 0 : index
    %c0_21 = arith.constant 0 : index
    %c0_22 = arith.constant 0 : index
    %25 = vector.load %arg4[%c0_20, %c0_21, %c0_22] : memref<1x8x128xf32, #tpu.memory_space<vmem>>, vector<1x1x128xf32>
    %26 = vector.shape_cast %25 : vector<1x1x128xf32> to vector<1x128xf32>
    %27 = vector.shape_cast %24 : vector<1x128xf32> to vector<1x1x128xf32>
    tpu.vector_store %arg4[%c0_20, %c0_21, %c0_22], %27 {strides = array<i32>} : memref<1x8x128xf32, #tpu.memory_space<vmem>>, vector<1x1x128xf32>,
    %c0_23 = arith.constant 0 : index
    %c0_24 = arith.constant 0 : index
    %c0_25 = arith.constant 0 : index
    %28 = vector.load %arg5[%c0_23, %c0_24, %c0_25] : memref<1x8x128xf32, #tpu.memory_space<vmem>>, vector<1x1x128xf32>
    %29 = vector.shape_cast %28 : vector<1x1x128xf32> to vector<1x128xf32>
    %30 = arith.mulf %19, %19 : vector<256x128xf32>
    %cst_26 = arith.constant dense<0.000000e+00> : vector<128xf32>
    %31 = vector.multi_reduction <add>, %30, %cst_26 [0] : vector<256x128xf32> to vector<128xf32>
    %32 = vector.shape_cast %31 : vector<128xf32> to vector<1x128xf32>
    %33 = arith.addf %29, %32 : vector<1x128xf32>
    %c0_27 = arith.constant 0 : index
    %c0_28 = arith.constant 0 : index
    %c0_29 = arith.constant 0 : index
    %34 = vector.load %arg5[%c0_27, %c0_28, %c0_29] : memref<1x8x128xf32, #tpu.memory_space<vmem>>, vector<1x1x128xf32>
    %35 = vector.shape_cast %34 : vector<1x1x128xf32> to vector<1x128xf32>
    %36 = vector.shape_cast %33 : vector<1x128xf32> to vector<1x1x128xf32>
    tpu.vector_store %arg5[%c0_27, %c0_28, %c0_29], %36 {strides = array<i32>} : memref<1x8x128xf32, #tpu.memory_space<vmem>>, vector<1x1x128xf32>,
    return
  }
  func.func @transform_0(%arg0: i32, %arg1: i32) -> (i32, i32, i32) {
    %c1_i32 = arith.constant 1 : i32
    %0 = arith.muli %arg0, %c1_i32 : i32
    %1 = arith.addi %0, %arg1 : i32
    %c0_i32 = arith.constant 0 : i32
    %c0_i32_0 = arith.constant 0 : i32
    %c0_i32_1 = arith.constant 0 : i32
    return %1, %c0_i32, %c0_i32_0 : i32, i32, i32
  }
  func.func @transform_1(%arg0: i32, %arg1: i32) -> (i32, i32, i32) {
    %c0_i32 = arith.constant 0 : i32
    %c0_i32_0 = arith.constant 0 : i32
    %c0_i32_1 = arith.constant 0 : i32
    %c0_i32_2 = arith.constant 0 : i32
    return %c0_i32, %c0_i32_0, %c0_i32_1 : i32, i32, i32
  }
  func.func @transform_2(%arg0: i32, %arg1: i32) -> (i32, i32, i32) {
    %c0_i32 = arith.constant 0 : i32
    %c0_i32_0 = arith.constant 0 : i32
    %c0_i32_1 = arith.constant 0 : i32
    return %arg0, %c0_i32, %c0_i32_0 : i32, i32, i32
  }
  func.func @transform_3(%arg0: i32, %arg1: i32) -> (i32, i32, i32) {
    %c0_i32 = arith.constant 0 : i32
    %c0_i32_0 = arith.constant 0 : i32
    %c0_i32_1 = arith.constant 0 : i32
    return %arg0, %c0_i32, %c0_i32_0 : i32, i32, i32
  }
}

module attributes {stable_mosaic.version = 11 : i64} {
  func.func @_p2_recompute_kernel(%arg0: i32, %arg1: memref<1x288x12xbf16, #tpu.memory_space<vmem>>, %arg2: memref<3x12x128xbf16, #tpu.memory_space<vmem>>, %arg3: memref<1x128xf32, #tpu.memory_space<vmem>>, %arg4: memref<1x128xf32, #tpu.memory_space<vmem>>, %arg5: memref<1x256x128xf32, #tpu.memory_space<vmem>>) attributes {dimension_semantics = [#tpu.dimension_semantics<parallel>], iteration_bounds = array<i64: 2>, scalar_prefetch = 0 : i64, scratch_operands = 0 : i64, tpu.core_type = #tpu.core_type<tc>, window_params = [{transform_indices = @transform_0, window_bounds = array<i64: 1, 288, 12>}, {pipeline_mode = #tpu.pipeline_mode<synchronous>, transform_indices = @transform_1, window_bounds = array<i64: 3, 12, 128>}, {pipeline_mode = #tpu.pipeline_mode<synchronous>, transform_indices = @transform_2, window_bounds = array<i64: 1, 128>}, {pipeline_mode = #tpu.pipeline_mode<synchronous>, transform_indices = @transform_3, window_bounds = array<i64: 1, 128>}, {transform_indices = @transform_4, window_bounds = array<i64: 1, 256, 128>}]} {
    %c0 = arith.constant 0 : index
    %c0_0 = arith.constant 0 : index
    %c0_1 = arith.constant 0 : index
    %0 = vector.load %arg1[%c0, %c0_0, %c0_1] : memref<1x288x12xbf16, #tpu.memory_space<vmem>>, vector<1x256x12xbf16>
    %1 = vector.shape_cast %0 : vector<1x256x12xbf16> to vector<256x12xbf16>
    %c0_2 = arith.constant 0 : index
    %c0_3 = arith.constant 0 : index
    %c0_4 = arith.constant 0 : index
    %2 = vector.load %arg2[%c0_2, %c0_3, %c0_4] : memref<3x12x128xbf16, #tpu.memory_space<vmem>>, vector<1x12x128xbf16>
    %3 = vector.shape_cast %2 : vector<1x12x128xbf16> to vector<12x128xbf16>
    %cst = arith.constant dense<0.000000e+00> : vector<256x128xf32>
    %4 = tpu.matmul %1, %3, %cst {dimension_numbers = #tpu.dot_dimension_numbers<[1], [0], [0], [1], [0, 0, 1, 1], [], []>} : vector<256x12xbf16>, vector<12x128xbf16>, vector<256x128xf32> -> vector<256x128xf32>
    %c0_5 = arith.constant 0 : index
    %c16 = arith.constant 16 : index
    %c0_6 = arith.constant 0 : index
    %5 = vector.load %arg1[%c0_5, %c16, %c0_6] : memref<1x288x12xbf16, #tpu.memory_space<vmem>>, vector<1x256x12xbf16>
    %6 = vector.shape_cast %5 : vector<1x256x12xbf16> to vector<256x12xbf16>
    %c1 = arith.constant 1 : index
    %c0_7 = arith.constant 0 : index
    %c0_8 = arith.constant 0 : index
    %7 = vector.load %arg2[%c1, %c0_7, %c0_8] : memref<3x12x128xbf16, #tpu.memory_space<vmem>>, vector<1x12x128xbf16>
    %8 = vector.shape_cast %7 : vector<1x12x128xbf16> to vector<12x128xbf16>
    %cst_9 = arith.constant dense<0.000000e+00> : vector<256x128xf32>
    %9 = tpu.matmul %6, %8, %cst_9 {dimension_numbers = #tpu.dot_dimension_numbers<[1], [0], [0], [1], [0, 0, 1, 1], [], []>} : vector<256x12xbf16>, vector<12x128xbf16>, vector<256x128xf32> -> vector<256x128xf32>
    %10 = arith.addf %4, %9 : vector<256x128xf32>
    %c0_10 = arith.constant 0 : index
    %c32 = arith.constant 32 : index
    %c0_11 = arith.constant 0 : index
    %11 = vector.load %arg1[%c0_10, %c32, %c0_11] : memref<1x288x12xbf16, #tpu.memory_space<vmem>>, vector<1x256x12xbf16>
    %12 = vector.shape_cast %11 : vector<1x256x12xbf16> to vector<256x12xbf16>
    %c2 = arith.constant 2 : index
    %c0_12 = arith.constant 0 : index
    %c0_13 = arith.constant 0 : index
    %13 = vector.load %arg2[%c2, %c0_12, %c0_13] : memref<3x12x128xbf16, #tpu.memory_space<vmem>>, vector<1x12x128xbf16>
    %14 = vector.shape_cast %13 : vector<1x12x128xbf16> to vector<12x128xbf16>
    %cst_14 = arith.constant dense<0.000000e+00> : vector<256x128xf32>
    %15 = tpu.matmul %12, %14, %cst_14 {dimension_numbers = #tpu.dot_dimension_numbers<[1], [0], [0], [1], [0, 0, 1, 1], [], []>} : vector<256x12xbf16>, vector<12x128xbf16>, vector<256x128xf32> -> vector<256x128xf32>
    %16 = arith.addf %10, %15 : vector<256x128xf32>
    %c0_15 = arith.constant 0 : index
    %c0_16 = arith.constant 0 : index
    %17 = vector.load %arg3[%c0_15, %c0_16] : memref<1x128xf32, #tpu.memory_space<vmem>>, vector<1x128xf32>
    %18 = vector.broadcast %17 : vector<1x128xf32> to vector<256x128xf32>
    %19 = arith.mulf %16, %18 : vector<256x128xf32>
    %c0_17 = arith.constant 0 : index
    %c0_18 = arith.constant 0 : index
    %20 = vector.load %arg4[%c0_17, %c0_18] : memref<1x128xf32, #tpu.memory_space<vmem>>, vector<1x128xf32>
    %21 = vector.broadcast %20 : vector<1x128xf32> to vector<256x128xf32>
    %22 = arith.addf %19, %21 : vector<256x128xf32>
    %cst_19 = arith.constant 0.000000e+00 : f32
    %23 = vector.broadcast %cst_19 : f32 to vector<256x128xf32>
    %24 = arith.maximumf %22, %23 : vector<256x128xf32>
    %c0_20 = arith.constant 0 : index
    %c0_21 = arith.constant 0 : index
    %c0_22 = arith.constant 0 : index
    %25 = vector.load %arg5[%c0_20, %c0_21, %c0_22] : memref<1x256x128xf32, #tpu.memory_space<vmem>>, vector<1x256x128xf32>
    %26 = vector.shape_cast %25 : vector<1x256x128xf32> to vector<256x128xf32>
    %27 = vector.shape_cast %24 : vector<256x128xf32> to vector<1x256x128xf32>
    tpu.vector_store %arg5[%c0_20, %c0_21, %c0_22], %27 {strides = array<i32>} : memref<1x256x128xf32, #tpu.memory_space<vmem>>, vector<1x256x128xf32>,
    return
  }
  func.func @transform_0(%arg0: i32) -> (i32, i32, i32) {
    %c0_i32 = arith.constant 0 : i32
    %c0_i32_0 = arith.constant 0 : i32
    %c0_i32_1 = arith.constant 0 : i32
    return %arg0, %c0_i32, %c0_i32_0 : i32, i32, i32
  }
  func.func @transform_1(%arg0: i32) -> (i32, i32, i32) {
    %c0_i32 = arith.constant 0 : i32
    %c0_i32_0 = arith.constant 0 : i32
    %c0_i32_1 = arith.constant 0 : i32
    %c0_i32_2 = arith.constant 0 : i32
    return %c0_i32, %c0_i32_0, %c0_i32_1 : i32, i32, i32
  }
  func.func @transform_2(%arg0: i32) -> (i32, i32) {
    %c0_i32 = arith.constant 0 : i32
    %c0_i32_0 = arith.constant 0 : i32
    %c0_i32_1 = arith.constant 0 : i32
    return %c0_i32, %c0_i32_0 : i32, i32
  }
  func.func @transform_3(%arg0: i32) -> (i32, i32) {
    %c0_i32 = arith.constant 0 : i32
    %c0_i32_0 = arith.constant 0 : i32
    %c0_i32_1 = arith.constant 0 : i32
    return %c0_i32, %c0_i32_0 : i32, i32
  }
  func.func @transform_4(%arg0: i32) -> (i32, i32, i32) {
    %c0_i32 = arith.constant 0 : i32
    %c0_i32_0 = arith.constant 0 : i32
    %c0_i32_1 = arith.constant 0 : i32
    return %arg0, %c0_i32, %c0_i32_0 : i32, i32, i32
  }
}

</mosaic_0001>

<bundles_post_ra>
// kernel: basic_conv2d.2
= control target key start
LH: loop header
LB: loop body
LE: loop exit
PB: predicated region body
PF: predicated region fallthrough
CT: control target
= control target key end

     0   :  { %s1389_s12 = smov 0   ;;  %s1391_s13 = smov 0   ;;  %s1610_s0 = inlined_call_operand.vmem [shape: bf16[2,288,12], index: 0, kind: input, shape index: {}]   ;;  %s1611_s1 = inlined_call_operand.vmem [shape: bf16[3,12,128], index: 1, kind: input, shape index: {}]   ;;  %s1612_s2 = inlined_call_operand.vmem [shape: f32[2,8,128], index: 2, kind: output, shape index: {0}]   ;;  %s1613_s3 = inlined_call_operand.vmem [shape: f32[2,8,128], index: 3, kind: output, shape index: {1}]  }
   0x1   :  { %s1393_s14 = smov 0  }
   0x2 LB: > { %s26_s15 = sadd.s32 1, %s1362_s13  ;;  %p1077_p0 = scmp.ge.s32.totalorder %s1366_s14, 1  ;;  %s1366_s14 = sphi %s1393_s14, %s14_s14   ;;  %s1362_s13 = sphi %s1391_s13, %s1615_s13   ;;  %s1358_s12 = sphi %s1389_s12, %s1614_s12  }
   0x3   : > { %p28_p1 = scmp.ge.s32.totalorder %s26_s15, 2  ;;  %p156_p2 = scmp.lt.s32.totalorder %s1366_s14, 3 }
   0x5   : > { %s1617_s15 = smov (%p28_p1, %s26_s15), 0  ;;  %p157_p3 = pnand %p1077_p0, %p156_p2 }
   0x6   : > { %p185_p4 = scmp.lt.s32.totalorder (!%p157_p3), %s1358_s12, 1 }
   0x7   : > { %160 = sbr.rel (%p157_p3) target bundleno = 374 (0x176), region = 28 }
   0xc   : > { %v1149_v0 = vld [vmem:[%s1611_s1 + $0x8] sm:$0xf]  ;;  %v1297_v1 = vld [vmem:[%s1611_s1 + $0x8] sm:$0x30]  ;;  %vm379_vm0 = vcmask 1045504   ;;  %s1619_s12 = smov (!%p185_p4, %s1358_s12), 1 }
   0xd   : > { %v1150_v2 = vor.u32 %v1297_v1, %v1149_v0  ;;  %v1173_v3 = vld [vmem:[%s1611_s1] sm:$0xf]  ;;  %v1295_v4 = vld [vmem:[%s1611_s1] sm:$0x30]  ;;  %v1259_v5 = vld [vmem:[%s1611_s1 + $0x10] sm:$0xf] }
   0xe   : > { %v1174_v6 = vor.u32 %v1295_v4, %v1173_v3  ;;  %v1314_v7 = vld [vmem:[%s1611_s1 + $0x10] sm:$0x30]  ;;  %s1318_s28 = smul.u32 144, %s1619_s12  ;;  %vm330_vm1 = vcmask 97280   ;;  %s1079_s5 = sshll.u32 %s1619_s12, 3 }
   0xf   : > { %v381_v8 = vsel %vm379_vm0, %v1150_v2, 0  ;;  %v1260_v9 = vor.u32 %v1314_v7, %v1259_v5  ;;  %s1572_s8 = scalar_lea.vmem %s1612_s2, %s1079_s5  ;;  %s1577_s11 = scalar_lea.vmem %s1613_s3, %s1079_s5 }
  0x10   : > { %390 = vmatpush.bf16.msra.mxu0 %v381_v8  ;;  %1315 = vmatpush.bf16.msra.mxu3 %v381_v8  ;;  %v486_v10 = vsel %vm379_vm0, %v1174_v6, 0  ;;  %s1434_s4 = scalar_lea.vmem %s1610_s0, %s1318_s28 }
  0x11   : > { %495 = vmatpush.bf16.msra.mxu1 %v486_v10  ;;  %v746_v11 = vsel %vm379_vm0, %v1260_v9, 0  ;;  %v1280_v12 = vld [vmem:[%s1434_s4 + $0x8] sm:$0xff]  ;;  %v1279_v14 = vld [vmem:[%s1434_s4] sm:$0xff]  ;;  %v1298_v15 = vld [vmem:[%s1434_s4 + $0x10] sm:$0xff] }
  0x12   : > { %755 = vmatpush.bf16.msra.mxu2 %v746_v11  ;;  %v1292_v13 = vld [vmem:[%s1434_s4 + $0x68] sm:$0xff]  ;;  %v1281_v16 = vld [vmem:[%s1434_s4 + $0x10] sm:$0xff]  ;;  %v1299_v18 = vld [vmem:[%s1434_s4 + $0x18] sm:$0xff] }
  0x13   : > { %1151 = vmatmul.msk.bf16.vlgmr.msra.gmra.mxu0 %vm330_vm1, %v1280_v12  ;;  %1163 = vmatmul.msk.bf16.vlgmr.msra.gmra.mxu3 %vm330_vm1, %v1292_v13  ;;  %v1293_v17 = vld [vmem:[%s1434_s4 + $0x70] sm:$0xff]  ;;  %v1282_v19 = vld [vmem:[%s1434_s4 + $0x18] sm:$0xff]  ;;  %v1300_v21 = vld [vmem:[%s1434_s4 + $0x20] sm:$0xff] }
  0x14   : > { %1316 = vmatpush.bf16.msrb.mxu3 %v486_v10  ;;  %1175 = vmatmul.msk.bf16.vlgmr.msra.gmra.mxu1 %vm330_vm1, %v1279_v14  ;;  %v1294_v20 = vld [vmem:[%s1434_s4 + $0x78] sm:$0xff]  ;;  %v1283_v22 = vld [vmem:[%s1434_s4 + $0x20] sm:$0xff]  ;;  %v1301_v24 = vld [vmem:[%s1434_s4 + $0x28] sm:$0xff] }
  0x15   : > { %1261 = vmatmul.msk.bf16.vlgmr.msra.gmra.mxu2 %vm330_vm1, %v1298_v15  ;;  %v1296_v23 = vld [vmem:[%s1434_s4 + $0x80] sm:$0xff]  ;;  %v1284_v25 = vld [vmem:[%s1434_s4 + $0x28] sm:$0xff]  ;;  %v1302_v27 = vld [vmem:[%s1434_s4 + $0x30] sm:$0xff] }
  0x16   : > { %v1467_v26 = vld [vmem:[%s1434_s4 + $0x60] sm:$0xff]  ;;  %v1285_v28 = vld [vmem:[%s1434_s4 + $0x30] sm:$0xff]  ;;  %v1303_v29 = vld [vmem:[%s1434_s4 + $0x38] sm:$0xff] }
  0x17   : > { %v1286_v30 = vld [vmem:[%s1434_s4 + $0x38] sm:$0xff]  ;;  %v1304_v31 = vld [vmem:[%s1434_s4 + $0x40] sm:$0xff]  ;;  %v1305_v33 = vld [vmem:[%s1434_s4 + $0x48] sm:$0xff] }
  0x18   : > { %1317 = vmatpush.bf16.msra.mxu3 %v746_v11  ;;  %v1287_v32 = vld [vmem:[%s1434_s4 + $0x40] sm:$0xff]  ;;  %v1288_v34 = vld [vmem:[%s1434_s4 + $0x48] sm:$0xff]  ;;  %v1310_v35 = vld [vmem:[%s1434_s4 + $0x70] sm:$0xff] }
  0x19   : > { %v1306_v37 = vld [vmem:[%s1434_s4 + $0x50] sm:$0xff]  ;;  %v1311_v49 = vld [vmem:[%s1434_s4 + $0x78] sm:$0xff]  ;;  %v1312_v7 = vld [vmem:[%s1434_s4 + $0x80] sm:$0xff] }
  0x1a   : > { %v1289_v48 = vld [vmem:[%s1434_s4 + $0x50] sm:$0xff]  ;;  %v1307_v52 = vld [vmem:[%s1434_s4 + $0x58] sm:$0xff]  ;;  %v1308_v10 = vld [vmem:[%s1434_s4 + $0x60] sm:$0xff] }
  0x1b   : > { %v1290_v6 = vld [vmem:[%s1434_s4 + $0x58] sm:$0xff] }
  0x23   : > { %1152 = vmatmul.msk.bf16.gmra.mxu0 %vm330_vm1, %v1281_v16  ;;  %1164 = vmatmul.msk.bf16.gmra.mxu3 %vm330_vm1, %v1293_v17 }
  0x24   : > { %1176 = vmatmul.msk.bf16.gmra.mxu1 %vm330_vm1, %v1280_v12 }
  0x25   : > { %1262 = vmatmul.msk.bf16.gmra.mxu2 %vm330_vm1, %v1299_v18 }
  0x33   : > { %1153 = vmatmul.msk.bf16.gmra.mxu0 %vm330_vm1, %v1282_v19  ;;  %1165 = vmatmul.msk.bf16.gmra.mxu3 %vm330_vm1, %v1294_v20 }
  0x34   : > { %1177 = vmatmul.msk.bf16.gmra.mxu1 %vm330_vm1, %v1281_v16 }
  0x35   : > { %1263 = vmatmul.msk.bf16.gmra.mxu2 %vm330_vm1, %v1300_v21 }
  0x43   : > { %1154 = vmatmul.msk.bf16.gmra.mxu0 %vm330_vm1, %v1283_v22  ;;  %1166 = vmatmul.msk.bf16.gmra.mxu3 %vm330_vm1, %v1296_v23 }
  0x44   : > { %1178 = vmatmul.msk.bf16.gmra.mxu1 %vm330_vm1, %v1282_v19 }
  0x45   : > { %1264 = vmatmul.msk.bf16.gmra.mxu2 %vm330_vm1, %v1301_v24 }
  0x53   : > { %1155 = vmatmul.msk.bf16.gmra.mxu0 %vm330_vm1, %v1284_v25  ;;  %1187 = vmatmul.msk.bf16.vlgmr.msrb.gmra.mxu3 %vm330_vm1, %v1467_v26 }
  0x54   : > { %1179 = vmatmul.msk.bf16.gmra.mxu1 %vm330_vm1, %v1283_v22 }
  0x55   : > { %1265 = vmatmul.msk.bf16.gmra.mxu2 %vm330_vm1, %v1302_v27 }
  0x63   : > { %1156 = vmatmul.msk.bf16.gmra.mxu0 %vm330_vm1, %v1285_v28  ;;  %1188 = vmatmul.msk.bf16.gmra.mxu3 %vm330_vm1, %v1292_v13 }
  0x64   : > { %1180 = vmatmul.msk.bf16.gmra.mxu1 %vm330_vm1, %v1284_v25 }
  0x65   : > { %1266 = vmatmul.msk.bf16.gmra.mxu2 %vm330_vm1, %v1303_v29 }
  0x73   : > { %1157 = vmatmul.msk.bf16.gmra.mxu0 %vm330_vm1, %v1286_v30  ;;  %1189 = vmatmul.msk.bf16.gmra.mxu3 %vm330_vm1, %v1293_v17 }
  0x74   : > { %1181 = vmatmul.msk.bf16.gmra.mxu1 %vm330_vm1, %v1285_v28  ;;  %v1313_v28 = vld [vmem:[%s1434_s4 + $0x88] sm:$0xff] }
  0x75   : > { %1267 = vmatmul.msk.bf16.gmra.mxu2 %vm330_vm1, %v1304_v31  ;;  %v1309_v31 = vld [vmem:[%s1434_s4 + $0x68] sm:$0xff] }
  0x83   : > { %1158 = vmatmul.msk.bf16.gmra.mxu0 %vm330_vm1, %v1287_v32  ;;  %1190 = vmatmul.msk.bf16.gmra.mxu3 %vm330_vm1, %v1294_v20 }
  0x84   : > { %1182 = vmatmul.msk.bf16.gmra.mxu1 %vm330_vm1, %v1286_v30 }
  0x85   : > { %1268 = vmatmul.msk.bf16.gmra.mxu2 %vm330_vm1, %v1305_v33 }
  0x90   : > { %v392_v36 = vpop.f32.mrf.mxu0 }
  0x91   : > { %v497_v38 = vpop.f32.mrf.mxu1 }
  0x92   : > { %v498_v39 = vadd.f32 %v497_v38, %v392_v36 }
  0x93   : > { %1159 = vmatmul.msk.bf16.gmra.mxu0 %vm330_vm1, %v1288_v34  ;;  %1273 = vmatmul.msk.bf16.vlgmr.msra.gmra.mxu3 %vm330_vm1, %v1310_v35 }
  0x94   : > { %1183 = vmatmul.msk.bf16.gmra.mxu1 %vm330_vm1, %v1287_v32 }
  0x95   : > { %1269 = vmatmul.msk.bf16.gmra.mxu2 %vm330_vm1, %v1306_v37 }
  0x96   : > { %v1500_v40 = vpop.f32.mrf.mxu3 }
  0x98   : > { %v757_v41 = vpop.f32.mrf.mxu2  ;;  %v394_v43 = vpop.f32.mrf.mxu0 }
  0x99   : > { %v837_v42 = vadd.f32 %v757_v41, %v498_v39  ;;  %v499_v44 = vpop.f32.mrf.mxu1 }
  0x9a   : > { %v500_v45 = vadd.f32 %v499_v44, %v394_v43 }
  0x9b   : > { %v910_v54 = vmul.f32 %v837_v42, %v837_v42 }
  0x9e   : > { %v1502_v46 = vpop.f32.mrf.mxu3 }
  0xa0   : > { %v759_v47 = vpop.f32.mrf.mxu2  ;;  %v397_v51 = vpop.f32.mrf.mxu0 }
  0xa1   : > { %v838_v50 = vadd.f32 %v759_v47, %v500_v45  ;;  %v502_v53 = vpop.f32.mrf.mxu1 }
  0xa2   : > { %v503_v57 = vadd.f32 %v502_v53, %v397_v51 }
  0xa3   : > { %v870_v55 = vadd.f32 %v838_v50, %v837_v42  ;;  %v911_v56 = vmul.f32 %v838_v50, %v838_v50  ;;  %1160 = vmatmul.msk.bf16.gmra.mxu0 %vm330_vm1, %v1289_v48  ;;  %1274 = vmatmul.msk.bf16.gmra.mxu3 %vm330_vm1, %v1311_v49 }
  0xa4   : > { %1184 = vmatmul.msk.bf16.gmra.mxu1 %vm330_vm1, %v1288_v34 }
  0xa5   : > { %v942_v58 = vadd.f32 %v911_v56, %v910_v54  ;;  %1270 = vmatmul.msk.bf16.gmra.mxu2 %vm330_vm1, %v1307_v52 }
  0xa6   : > { %v1511_v59 = vpop.f32.mrf.mxu3 }
  0xa8   : > { %v762_v60 = vpop.f32.mrf.mxu2  ;;  %v399_v62 = vpop.f32.mrf.mxu0 }
  0xa9   : > { %v839_v61 = vadd.f32 %v762_v60, %v503_v57  ;;  %v504_v63 = vpop.f32.mrf.mxu1 }
  0xaa   : > { %v505_v2 = vadd.f32 %v504_v63, %v399_v62 }
  0xab   : > { %v871_v0 = vadd.f32 %v870_v55, %v839_v61  ;;  %v912_v1 = vmul.f32 %v839_v61, %v839_v61 }
  0xad   : > { %v943_v3 = vadd.f32 %v942_v58, %v912_v1 }
  0xae   : > { %v1513_v4 = vpop.f32.mrf.mxu3 }
  0xb0   : > { %v764_v5 = vpop.f32.mrf.mxu2  ;;  %v402_v9 = vpop.f32.mrf.mxu0 }
  0xb1   : > { %v840_v8 = vadd.f32 %v764_v5, %v505_v2  ;;  %v507_v11 = vpop.f32.mrf.mxu1 }
  0xb2   : > { %v508_v14 = vadd.f32 %v507_v11, %v402_v9 }
  0xb3   : > { %v872_v12 = vadd.f32 %v871_v0, %v840_v8  ;;  %v913_v13 = vmul.f32 %v840_v8, %v840_v8  ;;  %1161 = vmatmul.msk.bf16.gmra.mxu0 %vm330_vm1, %v1290_v6  ;;  %1275 = vmatmul.msk.bf16.gmra.mxu3 %vm330_vm1, %v1312_v7 }
  0xb4   : > { %1185 = vmatmul.msk.bf16.gmra.mxu1 %vm330_vm1, %v1289_v48 }
  0xb5   : > { %v944_v15 = vadd.f32 %v943_v3, %v913_v13  ;;  %1271 = vmatmul.msk.bf16.gmra.mxu2 %vm330_vm1, %v1308_v10 }
  0xb6   : > { %v1522_v16 = vpop.f32.mrf.mxu3 }
  0xb8   : > { %v767_v17 = vpop.f32.mrf.mxu2  ;;  %v404_v19 = vpop.f32.mrf.mxu0 }
  0xb9   : > { %v841_v18 = vadd.f32 %v767_v17, %v508_v14  ;;  %v509_v20 = vpop.f32.mrf.mxu1 }
  0xba   : > { %v510_v23 = vadd.f32 %v509_v20, %v404_v19 }
  0xbb   : > { %v873_v21 = vadd.f32 %v872_v12, %v841_v18  ;;  %v914_v22 = vmul.f32 %v841_v18, %v841_v18 }
  0xbd   : > { %v945_v24 = vadd.f32 %v944_v15, %v914_v22 }
  0xbe   : > { %v1524_v25 = vpop.f32.mrf.mxu3 }
  0xc0   : > { %v769_v27 = vpop.f32.mrf.mxu2  ;;  %v407_v30 = vpop.f32.mrf.mxu0 }
  0xc1   : > { %v842_v29 = vadd.f32 %v769_v27, %v510_v23  ;;  %v512_v32 = vpop.f32.mrf.mxu1 }
  0xc2   : > { %v513_v35 = vadd.f32 %v512_v32, %v407_v30 }
  0xc3   : > { %v874_v33 = vadd.f32 %v873_v21, %v842_v29  ;;  %v915_v34 = vmul.f32 %v842_v29, %v842_v29  ;;  %1162 = vmatmul.msk.bf16.gmra.mxu0 %vm330_vm1, %v1467_v26  ;;  %1276 = vmatmul.msk.bf16.gmra.mxu3 %vm330_vm1, %v1313_v28 }
  0xc4   : > { %1186 = vmatmul.msk.bf16.gmra.mxu1 %vm330_vm1, %v1290_v6 }
  0xc5   : > { %v946_v36 = vadd.f32 %v945_v24, %v915_v34  ;;  %1272 = vmatmul.msk.bf16.gmra.mxu2 %vm330_vm1, %v1309_v31 }
  0xc6   : > { %v1533_v37 = vpop.f32.mrf.mxu3 }
  0xc8   : > { %v772_v38 = vpop.f32.mrf.mxu2  ;;  %v409_v41 = vpop.f32.mrf.mxu0 }
  0xc9   : > { %v843_v39 = vadd.f32 %v772_v38, %v513_v35  ;;  %v514_v42 = vpop.f32.mrf.mxu1 }
  0xca   : > { %v515_v45 = vadd.f32 %v514_v42, %v409_v41 }
  0xcb   : > { %v875_v43 = vadd.f32 %v874_v33, %v843_v39  ;;  %v916_v44 = vmul.f32 %v843_v39, %v843_v39 }
  0xcd   : > { %v947_v47 = vadd.f32 %v946_v36, %v916_v44 }
  0xce   : > { %v1535_v48 = vpop.f32.mrf.mxu3 }
  0xd0   : > { %v774_v26 = vpop.f32.mrf.mxu2  ;;  %v412_v50 = vpop.f32.mrf.mxu0 }
  0xd1   : > { %v844_v49 = vadd.f32 %v774_v26, %v515_v45  ;;  %v517_v51 = vpop.f32.mrf.mxu1 }
  0xd2   : > { %v518_v54 = vadd.f32 %v517_v51, %v412_v50 }
  0xd3   : > { %v876_v52 = vadd.f32 %v875_v43, %v844_v49  ;;  %v917_v53 = vmul.f32 %v844_v49, %v844_v49 }
  0xd5   : > { %v948_v55 = vadd.f32 %v947_v47, %v917_v53 }
  0xd6   : > { %v557_v56 = vpop.f32.mrf.mxu3 }
  0xd7   : > { %v1538_v57 = vadd.f32 %v557_v56, %v1500_v40 }
  0xd8   : > { %v777_v58 = vpop.f32.mrf.mxu2  ;;  %v414_v61 = vpop.f32.mrf.mxu0 }
  0xd9   : > { %v845_v60 = vadd.f32 %v777_v58, %v518_v54  ;;  %v519_v62 = vpop.f32.mrf.mxu1 }
  0xda   : > { %v520_v1 = vadd.f32 %v519_v62, %v414_v61 }
  0xdb   : > { %v877_v63 = vadd.f32 %v876_v52, %v845_v60  ;;  %v918_v0 = vmul.f32 %v845_v60, %v845_v60 }
  0xdd   : > { %v949_v2 = vadd.f32 %v948_v55, %v918_v0 }
  0xde   : > { %v559_v3 = vpop.f32.mrf.mxu3 }
  0xdf   : > { %v1541_v5 = vadd.f32 %v559_v3, %v1502_v46 }
  0xe0   : > { %v779_v6 = vpop.f32.mrf.mxu2  ;;  %v417_v8 = vpop.f32.mrf.mxu0 }
  0xe1   : > { %v846_v7 = vadd.f32 %v779_v6, %v520_v1  ;;  %v522_v9 = vpop.f32.mrf.mxu1 }
  0xe2   : > { %v523_v40 = vadd.f32 %v522_v9, %v417_v8 }
  0xe3   : > { %v878_v10 = vadd.f32 %v877_v63, %v846_v7  ;;  %v919_v11 = vmul.f32 %v846_v7, %v846_v7 }
  0xe5   : > { %v950_v12 = vadd.f32 %v949_v2, %v919_v11 }
  0xe6   : > { %v562_v13 = vpop.f32.mrf.mxu3 }
  0xe7   : > { %v1544_v14 = vadd.f32 %v562_v13, %v1511_v59 }
  0xe8   : > { %v782_v15 = vpop.f32.mrf.mxu2  ;;  %v419_v18 = vpop.f32.mrf.mxu0 }
  0xe9   : > { %v847_v17 = vadd.f32 %v782_v15, %v523_v40  ;;  %v524_v19 = vpop.f32.mrf.mxu1 }
  0xea   : > { %v525_v46 = vadd.f32 %v524_v19, %v419_v18 }
  0xeb   : > { %v879_v20 = vadd.f32 %v878_v10, %v847_v17  ;;  %v920_v21 = vmul.f32 %v847_v17, %v847_v17 }
  0xed   : > { %v951_v22 = vadd.f32 %v950_v12, %v920_v21 }
  0xee   : > { %v564_v23 = vpop.f32.mrf.mxu3 }
  0xef   : > { %v1547_v24 = vadd.f32 %v564_v23, %v1513_v4  ;;  %v1368_v23 = vmov 0.0  }
  0xf0   : > { %v784_v27 = vpop.f32.mrf.mxu2  ;;  %v422_v29 = vpop.f32.mrf.mxu0  ;;  %204 = vst [vmem:[%s1572_s8] sm:$0xff] %v1368_v23 }
  0xf1   : > { %v848_v28 = vadd.f32 %v784_v27, %v525_v46  ;;  %v527_v30 = vpop.f32.mrf.mxu1  ;;  %205 = vst [vmem:[%s1577_s11] sm:$0xff] %v1368_v23 }
  0xf2   : > { %v528_v59 = vadd.f32 %v527_v30, %v422_v29 }
  0xf3   : > { %v880_v31 = vadd.f32 %v879_v20, %v848_v28  ;;  %v921_v32 = vmul.f32 %v848_v28, %v848_v28 }
  0xf5   : > { %v952_v33 = vadd.f32 %v951_v22, %v921_v32 }
  0xf6   : > { %v567_v34 = vpop.f32.mrf.mxu3 }
  0xf7   : > { %v1550_v35 = vadd.f32 %v567_v34, %v1522_v16 }
  0xf8   : > { %v787_v36 = vpop.f32.mrf.mxu2  ;;  %v424_v39 = vpop.f32.mrf.mxu0 }
  0xf9   : > { %v849_v38 = vadd.f32 %v787_v36, %v528_v59  ;;  %v529_v41 = vpop.f32.mrf.mxu1 }
  0xfa   : > { %v530_v40 = vadd.f32 %v529_v41, %v424_v39 }
  0xfb   : > { %v881_v42 = vadd.f32 %v880_v31, %v849_v38  ;;  %v922_v43 = vmul.f32 %v849_v38, %v849_v38 }
  0xfd   : > { %v953_v4 = vadd.f32 %v952_v33, %v922_v43 }
  0xfe   : > { %v569_v44 = vpop.f32.mrf.mxu3 }
  0xff   : > { %v1553_v45 = vadd.f32 %v569_v44, %v1524_v25 }
 0x100   : > { %v789_v47 = vpop.f32.mrf.mxu2  ;;  %v427_v26 = vpop.f32.mrf.mxu0 }
 0x101   : > { %v532_v49 = vpop.f32.mrf.mxu1  ;;  %v850_v13 = vadd.f32 %v789_v47, %v530_v40 }
 0x102   : > { %v533_v12 = vadd.f32 %v532_v49, %v427_v26 }
 0x103   : > { %v923_v46 = vmul.f32 %v850_v13, %v850_v13  ;;  %v882_v27 = vadd.f32 %v881_v42, %v850_v13 }
 0x105   : > { %v954_v59 = vadd.f32 %v953_v4, %v923_v46 }
 0x106   : > { %v572_v50 = vpop.f32.mrf.mxu3 }
 0x107   : > { %v1556_v51 = vadd.f32 %v572_v50, %v1533_v37 }
 0x108   : > { %v792_v16 = vpop.f32.mrf.mxu2  ;;  %v429_v52 = vpop.f32.mrf.mxu0 }
 0x109   : > { %v534_v53 = vpop.f32.mrf.mxu1  ;;  %v851_v18 = vadd.f32 %v792_v16, %v533_v12 }
 0x10a   : > { %v535_v19 = vadd.f32 %v534_v53, %v429_v52 }
 0x10b   : > { %v924_v28 = vmul.f32 %v851_v18, %v851_v18  ;;  %v883_v33 = vadd.f32 %v882_v27, %v851_v18 }
 0x10d   : > { %v955_v39 = vadd.f32 %v954_v59, %v924_v28 }
 0x10e   : > { %v1558_v54 = vpop.f32.mrf.mxu3 }
 0x110   : > { %v794_v55 = vpop.f32.mrf.mxu2  ;;  %v432_v56 = vpop.f32.mrf.mxu0 }
 0x111   : > { %v537_v58 = vpop.f32.mrf.mxu1  ;;  %v852_v22 = vadd.f32 %v794_v55, %v535_v19 }
 0x112   : > { %v538_v20 = vadd.f32 %v537_v58, %v432_v56 }
 0x113   : > { %v925_v34 = vmul.f32 %v852_v22, %v852_v22  ;;  %v884_v41 = vadd.f32 %v883_v33, %v852_v22 }
 0x115   : > { %v956_v42 = vadd.f32 %v955_v39, %v925_v34 }
 0x116   : > { %v1560_v60 = vpop.f32.mrf.mxu3 }
 0x117   : > { %v861_v22 = vadd.f32 %v1560_v60, %v1538_v57 }
 0x118   : > { %v797_v61 = vpop.f32.mrf.mxu2  ;;  %v434_v25 = vpop.f32.mrf.mxu0 }
 0x119   : > { %v539_v62 = vpop.f32.mrf.mxu1  ;;  %v853_v29 = vadd.f32 %v797_v61, %v538_v20  ;;  %v934_v34 = vmul.f32 %v861_v22, %v861_v22 }
 0x11a   : > { %v540_v31 = vadd.f32 %v539_v62, %v434_v25 }
 0x11b   : > { %v926_v43 = vmul.f32 %v853_v29, %v853_v29  ;;  %v885_v16 = vadd.f32 %v884_v41, %v853_v29 }
 0x11d   : > { %v957_v55 = vadd.f32 %v956_v42, %v926_v43 }
 0x11e   : > { %v1562_v0 = vpop.f32.mrf.mxu3 }
 0x120   : > { %v799_v63 = vpop.f32.mrf.mxu2  ;;  %v437_v1 = vpop.f32.mrf.mxu0 }
 0x121   : > { %v542_v37 = vpop.f32.mrf.mxu1  ;;  %v854_v38 = vadd.f32 %v799_v63, %v540_v31  ;;  %v862_v31 = vadd.f32 %v1562_v0, %v1541_v5 }
 0x122   : > { %v543_v32 = vadd.f32 %v542_v37, %v437_v1 }
 0x123   : > { %v927_v52 = vmul.f32 %v854_v38, %v854_v38  ;;  %v886_v56 = vadd.f32 %v885_v16, %v854_v38  ;;  %v935_v41 = vmul.f32 %v862_v31, %v862_v31 }
 0x125   : > { %v958_v1 = vadd.f32 %v957_v55, %v927_v52 }
 0x126   : > { %v1564_v6 = vpop.f32.mrf.mxu3 }
 0x128   : > { %v802_v2 = vpop.f32.mrf.mxu2  ;;  %v439_v3 = vpop.f32.mrf.mxu0 }
 0x129   : > { %v544_v7 = vpop.f32.mrf.mxu1  ;;  %v855_v26 = vadd.f32 %v802_v2, %v543_v32 }
 0x12a   : > { %v545_v49 = vadd.f32 %v544_v7, %v439_v3 }
 0x12b   : > { %v928_v58 = vmul.f32 %v855_v26, %v855_v26  ;;  %v887_v37 = vadd.f32 %v886_v56, %v855_v26 }
 0x12d   : > { %v959_v13 = vadd.f32 %v958_v1, %v928_v58 }
 0x12e   : > { %v1566_v11 = vpop.f32.mrf.mxu3 }
 0x12f   : > { %v864_v57 = vadd.f32 %v1566_v11, %v1547_v24 }
 0x130   : > { %v804_v8 = vpop.f32.mrf.mxu2  ;;  %v442_v9 = vpop.f32.mrf.mxu0 }
 0x131   : > { %v547_v10 = vpop.f32.mrf.mxu1  ;;  %v856_v53 = vadd.f32 %v804_v8, %v545_v49  ;;  %v937_v26 = vmul.f32 %v864_v57, %v864_v57 }
 0x132   : > { %v548_v50 = vadd.f32 %v547_v10, %v442_v9 }
 0x133   : > { %v929_v40 = vmul.f32 %v856_v53, %v856_v53  ;;  %v888_v2 = vadd.f32 %v887_v37, %v856_v53 }
 0x135   : > { %v960_v18 = vadd.f32 %v959_v13, %v929_v40 }
 0x136   : > { %v1581_v30 = vpop.f32.mrf.mxu3 }
 0x138   : > { %v807_v15 = vpop.f32.mrf.mxu2  ;;  %v444_v17 = vpop.f32.mrf.mxu0 }
 0x139   : > { %v549_v21 = vpop.f32.mrf.mxu1  ;;  %v857_v4 = vadd.f32 %v807_v15, %v548_v50 }
 0x13a   : > { %v550_v61 = vadd.f32 %v549_v21, %v444_v17 }
 0x13b   : > { %v930_v3 = vmul.f32 %v857_v4, %v857_v4  ;;  %v889_v8 = vadd.f32 %v888_v2, %v857_v4  ;;  %v869_v2 = vld [vmem:[%s1572_s8] sm:$0x1] }
 0x13d   : > { %v961_v20 = vadd.f32 %v960_v18, %v930_v3 }
 0x13e   : > { %v829_v62 = vpop.f32.mrf.mxu3 }
 0x13f   : > { %v866_v49 = vadd.f32 %v829_v62, %v1553_v45 }
 0x140   : > { %v809_v36 = vpop.f32.mrf.mxu2  ;;  %v447_v44 = vpop.f32.mrf.mxu0 }
 0x141   : > { %v552_v47 = vpop.f32.mrf.mxu1  ;;  %v858_v12 = vadd.f32 %v809_v36, %v550_v61  ;;  %v863_v36 = vadd.f32 %v1564_v6, %v1544_v14  ;;  %v575_v14 = vadd.f32 %v1558_v54, %v1535_v48  ;;  %v939_v53 = vmul.f32 %v866_v49, %v866_v49 }
 0x142   : > { %v553_v25 = vadd.f32 %v552_v47, %v447_v44  ;;  %v865_v47 = vadd.f32 %v1581_v30, %v1550_v35 }
 0x143   : > { %v931_v19 = vmul.f32 %v858_v12, %v858_v12  ;;  %v890_v46 = vadd.f32 %v889_v8, %v858_v12  ;;  %v936_v44 = vmul.f32 %v863_v36, %v863_v36 }
 0x144   : > { %v938_v16 = vmul.f32 %v865_v47, %v865_v47 }
 0x145   : > { %v962_v23 = vadd.f32 %v961_v20, %v931_v19 }
 0x146   : > { %v832_v29 = vpop.f32.mrf.mxu3 }
 0x147   : > { %v867_v24 = vadd.f32 %v832_v29, %v1556_v51 }
 0x148   : > { %v812_v63 = vpop.f32.mrf.mxu2  ;;  %v449_v9 = vpop.f32.mrf.mxu0 }
 0x149   : > { %v859_v7 = vadd.f32 %v812_v63, %v553_v25  ;;  %v554_v10 = vpop.f32.mrf.mxu1  ;;  %v940_v30 = vmul.f32 %v867_v24, %v867_v24 }
 0x14a   : > { %v555_v17 = vadd.f32 %v554_v10, %v449_v9  ;;  %v909_v9 = vld [vmem:[%s1577_s11] sm:$0x1] }
 0x14b   : > { %v932_v15 = vmul.f32 %v859_v7, %v859_v7  ;;  %v891_v27 = vadd.f32 %v890_v46, %v859_v7 }
 0x14d   : > { %v963_v32 = vadd.f32 %v962_v23, %v932_v15 }
 0x14e   : > { %v834_v6 = vpop.f32.mrf.mxu3 }
 0x14f   : > { %v868_v55 = vadd.f32 %v834_v6, %v575_v14 }
 0x150   : > { %v814_v21 = vpop.f32.mrf.mxu2 }
 0x151   : > { %v860_v28 = vadd.f32 %v814_v21, %v555_v17  ;;  %v941_v61 = vmul.f32 %v868_v55, %v868_v55 }
 0x153   : > { %v892_v59 = vadd.f32 %v891_v27, %v860_v28  ;;  %v933_v33 = vmul.f32 %v860_v28, %v860_v28 }
 0x155   : > { %v893_v38 = vadd.f32 %v892_v59, %v861_v22  ;;  %v964_v39 = vadd.f32 %v963_v32, %v933_v33 }
 0x157   : > { %v894_v60 = vadd.f32 %v893_v38, %v862_v31  ;;  %v965_v43 = vadd.f32 %v964_v39, %v934_v34 }
 0x159   : > { %v895_v5 = vadd.f32 %v894_v60, %v863_v36  ;;  %v966_v0 = vadd.f32 %v965_v43, %v935_v41 }
 0x15b   : > { %v967_v50 = vadd.f32 %v966_v0, %v936_v44  ;;  %v896_v42 = vadd.f32 %v895_v5, %v864_v57 }
 0x15d   : > { %v897_v11 = vadd.f32 %v896_v42, %v865_v47  ;;  %v968_v52 = vadd.f32 %v967_v50, %v937_v26 }
 0x15f   : > { %v898_v56 = vadd.f32 %v897_v11, %v866_v49  ;;  %v969_v35 = vadd.f32 %v968_v52, %v938_v16 }
 0x161   : > { %v899_v58 = vadd.f32 %v898_v56, %v867_v24  ;;  %v970_v4 = vadd.f32 %v969_v35, %v939_v53 }
 0x163   : > { %v900_v45 = vadd.f32 %v899_v58, %v868_v55  ;;  %v971_v25 = vadd.f32 %v970_v4, %v940_v30 }
 0x165   : > { %v901_v62 = vrot.slane %v900_v45, 4  ;;  %v972_v48 = vadd.f32 %v971_v25, %v941_v61 }
 0x167   : > { %v902_v54 = vadd.f32 %v901_v62, %v900_v45  ;;  %v973_v51 = vrot.slane %v972_v48, 4 }
 0x169   : > { %v903_v63 = vrot.slane %v902_v54, 2  ;;  %v974_v1 = vadd.f32 %v973_v51, %v972_v48 }
 0x16b   : > { %v904_v37 = vadd.f32 %v903_v63, %v902_v54  ;;  %v975_v40 = vrot.slane %v974_v1, 2 }
 0x16d   : > { %v905_v12 = vrot.slane %v904_v37, 1  ;;  %v976_v13 = vadd.f32 %v975_v40, %v974_v1 }
 0x16f   : > { %v906_v3 = vadd.f32 %v905_v12, %v904_v37  ;;  %v977_v7 = vrot.slane %v976_v13, 1 }
 0x171   : > { %v907_v10 = vadd.f32 %v906_v3, %v869_v2  ;;  %v978_v18 = vadd.f32 %v977_v7, %v976_v13 }
 0x173   : > { %908 = vst [vmem:[%s1572_s8] sm:$0x1] %v907_v10  ;;  %v979_v8 = vadd.f32 %v978_v18, %v909_v9 }
 0x175   : > { %980 = vst [vmem:[%s1577_s11] sm:$0x1] %v979_v8 }
 0x176 PF: > { %s14_s14 = sadd.s32 1, %s1366_s14   ;;  %s1614_s12 = smov %s1362_s13 }
 0x177   : > { %p11_p5 = scmp.ge.s32.totalorder %s14_s14, 4   ;;  %s1615_s13 = smov %s1617_s15 }
 0x179   :  { %13 = sbr.rel (!%p11_p5) target bundleno = 2 (0x2), region = 76 }

// kernel: basic_conv2d.3
= control target key start
LH: loop header
LB: loop body
LE: loop exit
PB: predicated region body
PF: predicated region fallthrough
CT: control target
= control target key end

     0   :  { %s1343_s15 = smov 0   ;;  %s1628_s0 = inlined_call_operand.vmem [shape: bf16[2,288,12], index: 0, kind: input, shape index: {}]   ;;  %s1629_s1 = inlined_call_operand.vmem [shape: bf16[3,12,128], index: 1, kind: input, shape index: {}]   ;;  %s1630_s2 = inlined_call_operand.vmem [shape: f32[1,128], index: 2, kind: input, shape index: {}]   ;;  %s1631_s3 = inlined_call_operand.vmem [shape: f32[1,128], index: 3, kind: input, shape index: {}]   ;;  %s1632_s4 = inlined_call_operand.vmem [shape: f32[2,256,128], index: 4, kind: output, shape index: {}]  }
   0x1 LB: > { %s1053_s16 = sadd.s32 4294967295, %s1316_s15   ;;  %p1057_p0 = scmp.ge.s32.totalorder %s1316_s15, 1  ;;  %s1316_s15 = sphi %s1343_s15, %s14_s15  }
   0x2   : > { %p162_p1 = scmp.lt.s32.totalorder %s1316_s15, 3 }
   0x4   : > { %p163_p2 = pnand %p1057_p0, %p162_p1 }
   0x5   : > { %p188_p3 = scmp.lt.s32.totalorder (!%p163_p2), %s1053_s16, 1 }
   0x6   : > { %166 = sbr.rel (%p163_p2) target bundleno = 345 (0x159), region = 36 }
   0xb   : > { %v1129_v0 = vld [vmem:[%s1629_s1 + $0x8] sm:$0xf]  ;;  %v1278_v1 = vld [vmem:[%s1629_s1 + $0x8] sm:$0x30]  ;;  %vm372_vm0 = vcmask 1045504   ;;  %s1634_s16 = smov (!%p188_p3, %s1053_s16), 1 }
   0xc   : > { %v1130_v2 = vor.u32 %v1278_v1, %v1129_v0  ;;  %v1153_v3 = vld [vmem:[%s1629_s1] sm:$0xf]  ;;  %v1276_v4 = vld [vmem:[%s1629_s1] sm:$0x30]  ;;  %v1239_v5 = vld [vmem:[%s1629_s1 + $0x10] sm:$0xf] }
   0xd   : > { %v1154_v6 = vor.u32 %v1276_v4, %v1153_v3  ;;  %v1295_v7 = vld [vmem:[%s1629_s1 + $0x10] sm:$0x30]  ;;  %s1299_s29 = smul.u32 144, %s1634_s16  ;;  %vm323_vm1 = vcmask 97280   ;;  %v1449_v41 = vld [vmem:[%s1630_s2] ss:$0 sm:$0xff] }
   0xe   : > { %v374_v8 = vsel %vm372_vm0, %v1130_v2, 0  ;;  %v1240_v9 = vor.u32 %v1295_v7, %v1239_v5  ;;  %v1454_v44 = vld [vmem:[%s1631_s3] ss:$0 sm:$0xff]  ;;  %s1259_s11 = sshll.u32 %s1634_s16, 8 }
   0xf   : > { %383 = vmatpush.bf16.msra.mxu0 %v374_v8  ;;  %1296 = vmatpush.bf16.msra.mxu3 %v374_v8  ;;  %v479_v10 = vsel %vm372_vm0, %v1154_v6, 0  ;;  %s1378_s6 = scalar_lea.vmem %s1628_s0, %s1299_s29  ;;  %s1462_s14 = scalar_lea.vmem %s1632_s4, %s1259_s11 }
  0x10   : > { %488 = vmatpush.bf16.msra.mxu1 %v479_v10  ;;  %v739_v11 = vsel %vm372_vm0, %v1240_v9, 0  ;;  %v1261_v12 = vld [vmem:[%s1378_s6 + $0x8] sm:$0xff]  ;;  %v1260_v14 = vld [vmem:[%s1378_s6] sm:$0xff]  ;;  %v1279_v15 = vld [vmem:[%s1378_s6 + $0x10] sm:$0xff] }
  0x11   : > { %748 = vmatpush.bf16.msra.mxu2 %v739_v11  ;;  %v1273_v13 = vld [vmem:[%s1378_s6 + $0x68] sm:$0xff]  ;;  %v1262_v16 = vld [vmem:[%s1378_s6 + $0x10] sm:$0xff]  ;;  %v1280_v18 = vld [vmem:[%s1378_s6 + $0x18] sm:$0xff] }
  0x12   : > { %1131 = vmatmul.msk.bf16.vlgmr.msra.gmra.mxu0 %vm323_vm1, %v1261_v12  ;;  %1143 = vmatmul.msk.bf16.vlgmr.msra.gmra.mxu3 %vm323_vm1, %v1273_v13  ;;  %v1274_v17 = vld [vmem:[%s1378_s6 + $0x70] sm:$0xff]  ;;  %v1263_v19 = vld [vmem:[%s1378_s6 + $0x18] sm:$0xff]  ;;  %v1281_v21 = vld [vmem:[%s1378_s6 + $0x20] sm:$0xff] }
  0x13   : > { %1297 = vmatpush.bf16.msrb.mxu3 %v479_v10  ;;  %1155 = vmatmul.msk.bf16.vlgmr.msra.gmra.mxu1 %vm323_vm1, %v1260_v14  ;;  %v1275_v20 = vld [vmem:[%s1378_s6 + $0x78] sm:$0xff]  ;;  %v1264_v22 = vld [vmem:[%s1378_s6 + $0x20] sm:$0xff]  ;;  %v1282_v24 = vld [vmem:[%s1378_s6 + $0x28] sm:$0xff] }
  0x14   : > { %1241 = vmatmul.msk.bf16.vlgmr.msra.gmra.mxu2 %vm323_vm1, %v1279_v15  ;;  %v1277_v23 = vld [vmem:[%s1378_s6 + $0x80] sm:$0xff]  ;;  %v1265_v25 = vld [vmem:[%s1378_s6 + $0x28] sm:$0xff]  ;;  %v1283_v27 = vld [vmem:[%s1378_s6 + $0x30] sm:$0xff] }
  0x15   : > { %v1411_v26 = vld [vmem:[%s1378_s6 + $0x60] sm:$0xff]  ;;  %v1266_v28 = vld [vmem:[%s1378_s6 + $0x30] sm:$0xff]  ;;  %v1284_v29 = vld [vmem:[%s1378_s6 + $0x38] sm:$0xff] }
  0x16   : > { %v1267_v30 = vld [vmem:[%s1378_s6 + $0x38] sm:$0xff]  ;;  %v1285_v31 = vld [vmem:[%s1378_s6 + $0x40] sm:$0xff]  ;;  %v1286_v33 = vld [vmem:[%s1378_s6 + $0x48] sm:$0xff] }
  0x17   : > { %1298 = vmatpush.bf16.msra.mxu3 %v739_v11  ;;  %v1268_v32 = vld [vmem:[%s1378_s6 + $0x40] sm:$0xff]  ;;  %v1269_v34 = vld [vmem:[%s1378_s6 + $0x48] sm:$0xff]  ;;  %v1291_v35 = vld [vmem:[%s1378_s6 + $0x70] sm:$0xff] }
  0x18   : > { %v1287_v37 = vld [vmem:[%s1378_s6 + $0x50] sm:$0xff]  ;;  %v1292_v54 = vld [vmem:[%s1378_s6 + $0x78] sm:$0xff]  ;;  %v1293_v11 = vld [vmem:[%s1378_s6 + $0x80] sm:$0xff] }
  0x19   : > { %v1270_v53 = vld [vmem:[%s1378_s6 + $0x50] sm:$0xff]  ;;  %v1288_v57 = vld [vmem:[%s1378_s6 + $0x58] sm:$0xff]  ;;  %v1289_v14 = vld [vmem:[%s1378_s6 + $0x60] sm:$0xff] }
  0x1a   : > { %v1271_v10 = vld [vmem:[%s1378_s6 + $0x58] sm:$0xff] }
  0x22   : > { %1132 = vmatmul.msk.bf16.gmra.mxu0 %vm323_vm1, %v1262_v16  ;;  %1144 = vmatmul.msk.bf16.gmra.mxu3 %vm323_vm1, %v1274_v17 }
  0x23   : > { %1156 = vmatmul.msk.bf16.gmra.mxu1 %vm323_vm1, %v1261_v12 }
  0x24   : > { %1242 = vmatmul.msk.bf16.gmra.mxu2 %vm323_vm1, %v1280_v18 }
  0x32   : > { %1133 = vmatmul.msk.bf16.gmra.mxu0 %vm323_vm1, %v1263_v19  ;;  %1145 = vmatmul.msk.bf16.gmra.mxu3 %vm323_vm1, %v1275_v20 }
  0x33   : > { %1157 = vmatmul.msk.bf16.gmra.mxu1 %vm323_vm1, %v1262_v16 }
  0x34   : > { %1243 = vmatmul.msk.bf16.gmra.mxu2 %vm323_vm1, %v1281_v21 }
  0x42   : > { %1134 = vmatmul.msk.bf16.gmra.mxu0 %vm323_vm1, %v1264_v22  ;;  %1146 = vmatmul.msk.bf16.gmra.mxu3 %vm323_vm1, %v1277_v23 }
  0x43   : > { %1158 = vmatmul.msk.bf16.gmra.mxu1 %vm323_vm1, %v1263_v19 }
  0x44   : > { %1244 = vmatmul.msk.bf16.gmra.mxu2 %vm323_vm1, %v1282_v24 }
  0x52   : > { %1135 = vmatmul.msk.bf16.gmra.mxu0 %vm323_vm1, %v1265_v25  ;;  %1167 = vmatmul.msk.bf16.vlgmr.msrb.gmra.mxu3 %vm323_vm1, %v1411_v26 }
  0x53   : > { %1159 = vmatmul.msk.bf16.gmra.mxu1 %vm323_vm1, %v1264_v22 }
  0x54   : > { %1245 = vmatmul.msk.bf16.gmra.mxu2 %vm323_vm1, %v1283_v27 }
  0x62   : > { %1136 = vmatmul.msk.bf16.gmra.mxu0 %vm323_vm1, %v1266_v28  ;;  %1168 = vmatmul.msk.bf16.gmra.mxu3 %vm323_vm1, %v1273_v13 }
  0x63   : > { %1160 = vmatmul.msk.bf16.gmra.mxu1 %vm323_vm1, %v1265_v25 }
  0x64   : > { %1246 = vmatmul.msk.bf16.gmra.mxu2 %vm323_vm1, %v1284_v29 }
  0x72   : > { %1137 = vmatmul.msk.bf16.gmra.mxu0 %vm323_vm1, %v1267_v30  ;;  %1169 = vmatmul.msk.bf16.gmra.mxu3 %vm323_vm1, %v1274_v17 }
  0x73   : > { %1161 = vmatmul.msk.bf16.gmra.mxu1 %vm323_vm1, %v1266_v28 }
  0x74   : > { %1247 = vmatmul.msk.bf16.gmra.mxu2 %vm323_vm1, %v1285_v31 }
  0x82   : > { %1138 = vmatmul.msk.bf16.gmra.mxu0 %vm323_vm1, %v1268_v32  ;;  %1170 = vmatmul.msk.bf16.gmra.mxu3 %vm323_vm1, %v1275_v20 }
  0x83   : > { %1162 = vmatmul.msk.bf16.gmra.mxu1 %vm323_vm1, %v1267_v30 }
  0x84   : > { %1248 = vmatmul.msk.bf16.gmra.mxu2 %vm323_vm1, %v1286_v33 }
  0x8f   : > { %v385_v36 = vpop.f32.mrf.mxu0 }
  0x90   : > { %v490_v38 = vpop.f32.mrf.mxu1 }
  0x91   : > { %v491_v39 = vadd.f32 %v490_v38, %v385_v36 }
  0x92   : > { %1139 = vmatmul.msk.bf16.gmra.mxu0 %vm323_vm1, %v1269_v34  ;;  %1253 = vmatmul.msk.bf16.vlgmr.msra.gmra.mxu3 %vm323_vm1, %v1291_v35  ;;  %v1290_v35 = vld [vmem:[%s1378_s6 + $0x68] sm:$0xff] }
  0x93   : > { %1163 = vmatmul.msk.bf16.gmra.mxu1 %vm323_vm1, %v1268_v32  ;;  %v1294_v32 = vld [vmem:[%s1378_s6 + $0x88] sm:$0xff] }
  0x94   : > { %1249 = vmatmul.msk.bf16.gmra.mxu2 %vm323_vm1, %v1287_v37 }
  0x95   : > { %v1444_v40 = vpop.f32.mrf.mxu3 }
  0x97   : > { %v750_v42 = vpop.f32.mrf.mxu2  ;;  %v387_v45 = vpop.f32.mrf.mxu0 }
  0x98   : > { %v830_v43 = vadd.f32 %v750_v42, %v491_v39  ;;  %v492_v46 = vpop.f32.mrf.mxu1 }
  0x99   : > { %v493_v50 = vadd.f32 %v492_v46, %v387_v45 }
  0x9a   : > { %v866_v47 = vmul.f32 %v1449_v41, %v830_v43 }
  0x9c   : > { %v902_v48 = vadd.f32 %v1454_v44, %v866_v47 }
  0x9d   : > { %v1464_v51 = vpop.f32.mrf.mxu3 }
  0x9e   : > { %v934_v49 = vmax.f32 %v902_v48, 0.0 }
  0x9f   : > { %v752_v52 = vpop.f32.mrf.mxu2  ;;  %v390_v56 = vpop.f32.mrf.mxu0 }
  0xa0   : > { %966 = vst [vmem:[%s1462_s14] sm:$0xff] %v934_v49  ;;  %v831_v55 = vadd.f32 %v752_v52, %v493_v50  ;;  %v495_v58 = vpop.f32.mrf.mxu1 }
  0xa1   : > { %v496_v61 = vadd.f32 %v495_v58, %v390_v56 }
  0xa2   : > { %v867_v59 = vmul.f32 %v1449_v41, %v831_v55  ;;  %1140 = vmatmul.msk.bf16.gmra.mxu0 %vm323_vm1, %v1270_v53  ;;  %1254 = vmatmul.msk.bf16.gmra.mxu3 %vm323_vm1, %v1292_v54 }
  0xa3   : > { %1164 = vmatmul.msk.bf16.gmra.mxu1 %vm323_vm1, %v1269_v34 }
  0xa4   : > { %v903_v60 = vadd.f32 %v1454_v44, %v867_v59  ;;  %1250 = vmatmul.msk.bf16.gmra.mxu2 %vm323_vm1, %v1288_v57 }
  0xa5   : > { %v1476_v63 = vpop.f32.mrf.mxu3 }
  0xa6   : > { %v935_v62 = vmax.f32 %v903_v60, 0.0 }
  0xa7   : > { %v755_v0 = vpop.f32.mrf.mxu2  ;;  %v392_v2 = vpop.f32.mrf.mxu0 }
  0xa8   : > { %967 = vst [vmem:[%s1462_s14 + $0x8] sm:$0xff] %v935_v62  ;;  %v832_v1 = vadd.f32 %v755_v0, %v496_v61  ;;  %v497_v3 = vpop.f32.mrf.mxu1 }
  0xa9   : > { %v498_v7 = vadd.f32 %v497_v3, %v392_v2 }
  0xaa   : > { %v868_v4 = vmul.f32 %v1449_v41, %v832_v1 }
  0xac   : > { %v904_v5 = vadd.f32 %v1454_v44, %v868_v4 }
  0xad   : > { %v1481_v8 = vpop.f32.mrf.mxu3 }
  0xae   : > { %v936_v6 = vmax.f32 %v904_v5, 0.0 }
  0xaf   : > { %v757_v9 = vpop.f32.mrf.mxu2  ;;  %v395_v13 = vpop.f32.mrf.mxu0 }
  0xb0   : > { %968 = vst [vmem:[%s1462_s14 + $0x10] sm:$0xff] %v936_v6  ;;  %v833_v12 = vadd.f32 %v757_v9, %v498_v7  ;;  %v500_v15 = vpop.f32.mrf.mxu1 }
  0xb1   : > { %v501_v18 = vadd.f32 %v500_v15, %v395_v13 }
  0xb2   : > { %v869_v16 = vmul.f32 %v1449_v41, %v833_v12  ;;  %1141 = vmatmul.msk.bf16.gmra.mxu0 %vm323_vm1, %v1271_v10  ;;  %1255 = vmatmul.msk.bf16.gmra.mxu3 %vm323_vm1, %v1293_v11 }
  0xb3   : > { %1165 = vmatmul.msk.bf16.gmra.mxu1 %vm323_vm1, %v1270_v53 }
  0xb4   : > { %v905_v17 = vadd.f32 %v1454_v44, %v869_v16  ;;  %1251 = vmatmul.msk.bf16.gmra.mxu2 %vm323_vm1, %v1289_v14 }
  0xb5   : > { %v1493_v20 = vpop.f32.mrf.mxu3 }
  0xb6   : > { %v937_v19 = vmax.f32 %v905_v17, 0.0 }
  0xb7   : > { %v760_v21 = vpop.f32.mrf.mxu2  ;;  %v397_v23 = vpop.f32.mrf.mxu0 }
  0xb8   : > { %969 = vst [vmem:[%s1462_s14 + $0x18] sm:$0xff] %v937_v19  ;;  %v834_v22 = vadd.f32 %v760_v21, %v501_v18  ;;  %v502_v24 = vpop.f32.mrf.mxu1 }
  0xb9   : > { %v503_v29 = vadd.f32 %v502_v24, %v397_v23 }
  0xba   : > { %v870_v25 = vmul.f32 %v1449_v41, %v834_v22 }
  0xbc   : > { %v906_v27 = vadd.f32 %v1454_v44, %v870_v25 }
  0xbd   : > { %v1498_v30 = vpop.f32.mrf.mxu3 }
  0xbe   : > { %v938_v28 = vmax.f32 %v906_v27, 0.0 }
  0xbf   : > { %v762_v31 = vpop.f32.mrf.mxu2  ;;  %v400_v34 = vpop.f32.mrf.mxu0 }
  0xc0   : > { %970 = vst [vmem:[%s1462_s14 + $0x20] sm:$0xff] %v938_v28  ;;  %v835_v33 = vadd.f32 %v762_v31, %v503_v29  ;;  %v505_v36 = vpop.f32.mrf.mxu1 }
  0xc1   : > { %v506_v39 = vadd.f32 %v505_v36, %v400_v34 }
  0xc2   : > { %v871_v37 = vmul.f32 %v1449_v41, %v835_v33  ;;  %1142 = vmatmul.msk.bf16.gmra.mxu0 %vm323_vm1, %v1411_v26  ;;  %1256 = vmatmul.msk.bf16.gmra.mxu3 %vm323_vm1, %v1294_v32 }
  0xc3   : > { %1166 = vmatmul.msk.bf16.gmra.mxu1 %vm323_vm1, %v1271_v10 }
  0xc4   : > { %v907_v38 = vadd.f32 %v1454_v44, %v871_v37  ;;  %1252 = vmatmul.msk.bf16.gmra.mxu2 %vm323_vm1, %v1290_v35 }
  0xc5   : > { %v1510_v43 = vpop.f32.mrf.mxu3 }
  0xc6   : > { %v939_v42 = vmax.f32 %v907_v38, 0.0 }
  0xc7   : > { %v765_v45 = vpop.f32.mrf.mxu2  ;;  %v402_v47 = vpop.f32.mrf.mxu0 }
  0xc8   : > { %971 = vst [vmem:[%s1462_s14 + $0x28] sm:$0xff] %v939_v42  ;;  %v836_v46 = vadd.f32 %v765_v45, %v506_v39  ;;  %v507_v48 = vpop.f32.mrf.mxu1 }
  0xc9   : > { %v508_v52 = vadd.f32 %v507_v48, %v402_v47 }
  0xca   : > { %v872_v26 = vmul.f32 %v1449_v41, %v836_v46 }
  0xcc   : > { %v908_v49 = vadd.f32 %v1454_v44, %v872_v26 }
  0xcd   : > { %v1515_v53 = vpop.f32.mrf.mxu3 }
  0xce   : > { %v940_v50 = vmax.f32 %v908_v49, 0.0 }
  0xcf   : > { %v767_v54 = vpop.f32.mrf.mxu2  ;;  %v405_v56 = vpop.f32.mrf.mxu0 }
  0xd0   : > { %972 = vst [vmem:[%s1462_s14 + $0x30] sm:$0xff] %v940_v50  ;;  %v837_v55 = vadd.f32 %v767_v54, %v508_v52  ;;  %v510_v57 = vpop.f32.mrf.mxu1 }
  0xd1   : > { %v511_v60 = vadd.f32 %v510_v57, %v405_v56 }
  0xd2   : > { %v873_v58 = vmul.f32 %v1449_v41, %v837_v55 }
  0xd4   : > { %v909_v59 = vadd.f32 %v1454_v44, %v873_v58 }
  0xd5   : > { %v1520_v62 = vpop.f32.mrf.mxu3 }
  0xd6   : > { %v941_v61 = vmax.f32 %v909_v59, 0.0 }
  0xd7   : > { %v770_v0 = vpop.f32.mrf.mxu2  ;;  %v407_v2 = vpop.f32.mrf.mxu0 }
  0xd8   : > { %973 = vst [vmem:[%s1462_s14 + $0x38] sm:$0xff] %v941_v61  ;;  %v838_v1 = vadd.f32 %v770_v0, %v511_v60  ;;  %v512_v3 = vpop.f32.mrf.mxu1 }
  0xd9   : > { %v513_v7 = vadd.f32 %v512_v3, %v407_v2 }
  0xda   : > { %v874_v4 = vmul.f32 %v1449_v41, %v838_v1 }
  0xdc   : > { %v910_v5 = vadd.f32 %v1454_v44, %v874_v4 }
  0xdd   : > { %v1525_v9 = vpop.f32.mrf.mxu3 }
  0xde   : > { %v942_v6 = vmax.f32 %v910_v5, 0.0 }
  0xdf   : > { %v772_v10 = vpop.f32.mrf.mxu2  ;;  %v410_v12 = vpop.f32.mrf.mxu0 }
  0xe0   : > { %974 = vst [vmem:[%s1462_s14 + $0x40] sm:$0xff] %v942_v6  ;;  %v839_v11 = vadd.f32 %v772_v10, %v513_v7  ;;  %v515_v13 = vpop.f32.mrf.mxu1 }
  0xe1   : > { %v516_v16 = vadd.f32 %v515_v13, %v410_v12 }
  0xe2   : > { %v875_v14 = vmul.f32 %v1449_v41, %v839_v11 }
  0xe4   : > { %v911_v15 = vadd.f32 %v1454_v44, %v875_v14 }
  0xe5   : > { %v1530_v18 = vpop.f32.mrf.mxu3 }
  0xe6   : > { %v943_v17 = vmax.f32 %v911_v15, 0.0 }
  0xe7   : > { %v775_v19 = vpop.f32.mrf.mxu2  ;;  %v412_v22 = vpop.f32.mrf.mxu0 }
  0xe8   : > { %975 = vst [vmem:[%s1462_s14 + $0x48] sm:$0xff] %v943_v17  ;;  %v840_v21 = vadd.f32 %v775_v19, %v516_v16  ;;  %v517_v23 = vpop.f32.mrf.mxu1 }
  0xe9   : > { %v518_v28 = vadd.f32 %v517_v23, %v412_v22 }
  0xea   : > { %v876_v24 = vmul.f32 %v1449_v41, %v840_v21  ;;  %v551_v21 = vadd.f32 %v1520_v62, %v1444_v40  ;;  %v553_v40 = vadd.f32 %v1525_v9, %v1464_v51 }
  0xec   : > { %v912_v25 = vadd.f32 %v1454_v44, %v876_v24 }
  0xed   : > { %v1535_v29 = vpop.f32.mrf.mxu3 }
  0xee   : > { %v944_v27 = vmax.f32 %v912_v25, 0.0 }
  0xef   : > { %v777_v31 = vpop.f32.mrf.mxu2  ;;  %v415_v33 = vpop.f32.mrf.mxu0 }
  0xf0   : > { %976 = vst [vmem:[%s1462_s14 + $0x50] sm:$0xff] %v944_v27  ;;  %v841_v32 = vadd.f32 %v777_v31, %v518_v28  ;;  %v520_v34 = vpop.f32.mrf.mxu1 }
  0xf1   : > { %v521_v37 = vadd.f32 %v520_v34, %v415_v33 }
  0xf2   : > { %v877_v35 = vmul.f32 %v1449_v41, %v841_v32 }
  0xf4   : > { %v913_v36 = vadd.f32 %v1454_v44, %v877_v35 }
  0xf5   : > { %v1540_v39 = vpop.f32.mrf.mxu3 }
  0xf6   : > { %v945_v38 = vmax.f32 %v913_v36, 0.0 }
  0xf7   : > { %v780_v42 = vpop.f32.mrf.mxu2  ;;  %v417_v46 = vpop.f32.mrf.mxu0 }
  0xf8   : > { %977 = vst [vmem:[%s1462_s14 + $0x58] sm:$0xff] %v945_v38  ;;  %v842_v45 = vadd.f32 %v780_v42, %v521_v37  ;;  %v522_v47 = vpop.f32.mrf.mxu1 }
  0xf9   : > { %v523_v50 = vadd.f32 %v522_v47, %v417_v46 }
  0xfa   : > { %v878_v48 = vmul.f32 %v1449_v41, %v842_v45 }
  0xfc   : > { %v914_v26 = vadd.f32 %v1454_v44, %v878_v48 }
  0xfd   : > { %v1545_v52 = vpop.f32.mrf.mxu3 }
  0xfe   : > { %v946_v49 = vmax.f32 %v914_v26, 0.0 }
  0xff   : > { %v782_v54 = vpop.f32.mrf.mxu2  ;;  %v420_v56 = vpop.f32.mrf.mxu0 }
 0x100   : > { %978 = vst [vmem:[%s1462_s14 + $0x60] sm:$0xff] %v946_v49  ;;  %v843_v55 = vadd.f32 %v782_v54, %v523_v50  ;;  %v525_v57 = vpop.f32.mrf.mxu1  ;;  %v556_v54 = vadd.f32 %v1530_v18, %v1476_v63  ;;  %v558_v18 = vadd.f32 %v1535_v29, %v1481_v8 }
 0x101   : > { %v526_v60 = vadd.f32 %v525_v57, %v420_v56 }
 0x102   : > { %v879_v58 = vmul.f32 %v1449_v41, %v843_v55 }
 0x104   : > { %v915_v59 = vadd.f32 %v1454_v44, %v879_v58 }
 0x105   : > { %v1550_v0 = vpop.f32.mrf.mxu3 }
 0x106   : > { %v947_v61 = vmax.f32 %v915_v59, 0.0 }
 0x107   : > { %v785_v1 = vpop.f32.mrf.mxu2  ;;  %v422_v3 = vpop.f32.mrf.mxu0 }
 0x108   : > { %979 = vst [vmem:[%s1462_s14 + $0x68] sm:$0xff] %v947_v61  ;;  %v844_v2 = vadd.f32 %v785_v1, %v526_v60  ;;  %v527_v4 = vpop.f32.mrf.mxu1 }
 0x109   : > { %v528_v10 = vadd.f32 %v527_v4, %v422_v3 }
 0x10a   : > { %v880_v5 = vmul.f32 %v1449_v41, %v844_v2 }
 0x10c   : > { %v916_v6 = vadd.f32 %v1454_v44, %v880_v5 }
 0x10d   : > { %v1555_v11 = vpop.f32.mrf.mxu3 }
 0x10e   : > { %v948_v7 = vmax.f32 %v916_v6, 0.0 }
 0x10f   : > { %v787_v12 = vpop.f32.mrf.mxu2  ;;  %v425_v14 = vpop.f32.mrf.mxu0 }
 0x110   : > { %980 = vst [vmem:[%s1462_s14 + $0x70] sm:$0xff] %v948_v7  ;;  %v845_v13 = vadd.f32 %v787_v12, %v528_v10  ;;  %v530_v15 = vpop.f32.mrf.mxu1 }
 0x111   : > { %v531_v19 = vadd.f32 %v530_v15, %v425_v14 }
 0x112   : > { %v881_v16 = vmul.f32 %v1449_v41, %v845_v13 }
 0x114   : > { %v917_v17 = vadd.f32 %v1454_v44, %v881_v16 }
 0x115   : > { %v810_v23 = vpop.f32.mrf.mxu3 }
 0x116   : > { %v949_v22 = vmax.f32 %v917_v17, 0.0  ;;  %v854_v25 = vadd.f32 %v810_v23, %v551_v21 }
 0x117   : > { %v790_v24 = vpop.f32.mrf.mxu2  ;;  %v427_v28 = vpop.f32.mrf.mxu0 }
 0x118   : > { %981 = vst [vmem:[%s1462_s14 + $0x78] sm:$0xff] %v949_v22  ;;  %v846_v27 = vadd.f32 %v790_v24, %v531_v19  ;;  %v890_v31 = vmul.f32 %v1449_v41, %v854_v25  ;;  %v532_v32 = vpop.f32.mrf.mxu1  ;;  %v561_v22 = vadd.f32 %v1540_v39, %v1493_v20  ;;  %v563_v39 = vadd.f32 %v1545_v52, %v1498_v30 }
 0x119   : > { %v533_v37 = vadd.f32 %v532_v32, %v427_v28 }
 0x11a   : > { %v882_v33 = vmul.f32 %v1449_v41, %v846_v27  ;;  %v926_v34 = vadd.f32 %v1454_v44, %v890_v31 }
 0x11c   : > { %v918_v35 = vadd.f32 %v1454_v44, %v882_v33  ;;  %v958_v62 = vmax.f32 %v926_v34, 0.0 }
 0x11d   : > { %v812_v38 = vpop.f32.mrf.mxu3 }
 0x11e   : > { %v950_v36 = vmax.f32 %v918_v35, 0.0  ;;  %990 = vst [vmem:[%s1462_s14 + $0xc0] sm:$0xff] %v958_v62  ;;  %v855_v45 = vadd.f32 %v812_v38, %v553_v40 }
 0x11f   : > { %v792_v42 = vpop.f32.mrf.mxu2  ;;  %v430_v47 = vpop.f32.mrf.mxu0 }
 0x120   : > { %982 = vst [vmem:[%s1462_s14 + $0x80] sm:$0xff] %v950_v36  ;;  %v847_v46 = vadd.f32 %v792_v42, %v533_v37  ;;  %v891_v48 = vmul.f32 %v1449_v41, %v855_v45  ;;  %v535_v26 = vpop.f32.mrf.mxu1 }
 0x121   : > { %v536_v9 = vadd.f32 %v535_v26, %v430_v47 }
 0x122   : > { %v883_v49 = vmul.f32 %v1449_v41, %v847_v46  ;;  %v927_v50 = vadd.f32 %v1454_v44, %v891_v48 }
 0x124   : > { %v919_v51 = vadd.f32 %v1454_v44, %v883_v49  ;;  %v959_v55 = vmax.f32 %v927_v50, 0.0 }
 0x125   : > { %v815_v57 = vpop.f32.mrf.mxu3 }
 0x126   : > { %v951_v56 = vmax.f32 %v919_v51, 0.0  ;;  %991 = vst [vmem:[%s1462_s14 + $0xc8] sm:$0xff] %v959_v55  ;;  %v856_v59 = vadd.f32 %v815_v57, %v556_v54  ;;  %v566_v51 = vadd.f32 %v1550_v0, %v1510_v43  ;;  %v568_v0 = vadd.f32 %v1555_v11, %v1515_v53 }
 0x127   : > { %v795_v58 = vpop.f32.mrf.mxu2  ;;  %v432_v61 = vpop.f32.mrf.mxu0 }
 0x128   : > { %983 = vst [vmem:[%s1462_s14 + $0x88] sm:$0xff] %v951_v56  ;;  %v848_v60 = vadd.f32 %v795_v58, %v536_v9  ;;  %v892_v1 = vmul.f32 %v1449_v41, %v856_v59  ;;  %v537_v2 = vpop.f32.mrf.mxu1 }
 0x129   : > { %v538_v7 = vadd.f32 %v537_v2, %v432_v61 }
 0x12a   : > { %v884_v3 = vmul.f32 %v1449_v41, %v848_v60  ;;  %v928_v4 = vadd.f32 %v1454_v44, %v892_v1 }
 0x12c   : > { %v920_v63 = vadd.f32 %v1454_v44, %v884_v3  ;;  %v960_v5 = vmax.f32 %v928_v4, 0.0 }
 0x12d   : > { %v817_v10 = vpop.f32.mrf.mxu3 }
 0x12e   : > { %v952_v6 = vmax.f32 %v920_v63, 0.0  ;;  %992 = vst [vmem:[%s1462_s14 + $0xd0] sm:$0xff] %v960_v5  ;;  %v857_v13 = vadd.f32 %v817_v10, %v558_v18 }
 0x12f   : > { %v797_v12 = vpop.f32.mrf.mxu2  ;;  %v435_v15 = vpop.f32.mrf.mxu0 }
 0x130   : > { %984 = vst [vmem:[%s1462_s14 + $0x90] sm:$0xff] %v952_v6  ;;  %v849_v14 = vadd.f32 %v797_v12, %v538_v7  ;;  %v893_v16 = vmul.f32 %v1449_v41, %v857_v13  ;;  %v540_v17 = vpop.f32.mrf.mxu1 }
 0x131   : > { %v541_v29 = vadd.f32 %v540_v17, %v435_v15 }
 0x132   : > { %v885_v19 = vmul.f32 %v1449_v41, %v849_v14  ;;  %v929_v21 = vadd.f32 %v1454_v44, %v893_v16 }
 0x134   : > { %v921_v8 = vadd.f32 %v1454_v44, %v885_v19  ;;  %v961_v23 = vmax.f32 %v929_v21, 0.0 }
 0x135   : > { %v820_v25 = vpop.f32.mrf.mxu3 }
 0x136   : > { %v953_v24 = vmax.f32 %v921_v8, 0.0  ;;  %993 = vst [vmem:[%s1462_s14 + $0xd8] sm:$0xff] %v961_v23  ;;  %v858_v28 = vadd.f32 %v820_v25, %v561_v22 }
 0x137   : > { %v800_v27 = vpop.f32.mrf.mxu2  ;;  %v437_v32 = vpop.f32.mrf.mxu0 }
 0x138   : > { %985 = vst [vmem:[%s1462_s14 + $0x98] sm:$0xff] %v953_v24  ;;  %v850_v31 = vadd.f32 %v800_v27, %v541_v29  ;;  %v894_v33 = vmul.f32 %v1449_v41, %v858_v28  ;;  %v542_v34 = vpop.f32.mrf.mxu1 }
 0x139   : > { %v543_v37 = vadd.f32 %v542_v34, %v437_v32 }
 0x13a   : > { %v886_v35 = vmul.f32 %v1449_v41, %v850_v31  ;;  %v930_v40 = vadd.f32 %v1454_v44, %v894_v33 }
 0x13c   : > { %v922_v20 = vadd.f32 %v1454_v44, %v886_v35  ;;  %v962_v62 = vmax.f32 %v930_v40, 0.0 }
 0x13d   : > { %v822_v38 = vpop.f32.mrf.mxu3 }
 0x13e   : > { %v954_v36 = vmax.f32 %v922_v20, 0.0  ;;  %994 = vst [vmem:[%s1462_s14 + $0xe0] sm:$0xff] %v962_v62  ;;  %v859_v45 = vadd.f32 %v822_v38, %v563_v39 }
 0x13f   : > { %v802_v42 = vpop.f32.mrf.mxu2  ;;  %v440_v48 = vpop.f32.mrf.mxu0 }
 0x140   : > { %986 = vst [vmem:[%s1462_s14 + $0xa0] sm:$0xff] %v954_v36  ;;  %v851_v46 = vadd.f32 %v802_v42, %v543_v37  ;;  %v895_v47 = vmul.f32 %v1449_v41, %v859_v45  ;;  %v545_v26 = vpop.f32.mrf.mxu1 }
 0x141   : > { %v546_v52 = vadd.f32 %v545_v26, %v440_v48 }
 0x142   : > { %v887_v49 = vmul.f32 %v1449_v41, %v851_v46  ;;  %v931_v50 = vadd.f32 %v1454_v44, %v895_v47 }
 0x144   : > { %v923_v30 = vadd.f32 %v1454_v44, %v887_v49  ;;  %v963_v9 = vmax.f32 %v931_v50, 0.0 }
 0x145   : > { %v825_v55 = vpop.f32.mrf.mxu3 }
 0x146   : > { %v955_v54 = vmax.f32 %v923_v30, 0.0  ;;  %995 = vst [vmem:[%s1462_s14 + $0xe8] sm:$0xff] %v963_v9  ;;  %v860_v57 = vadd.f32 %v825_v55, %v566_v51 }
 0x147   : > { %v805_v56 = vpop.f32.mrf.mxu2  ;;  %v442_v1 = vpop.f32.mrf.mxu0 }
 0x148   : > { %987 = vst [vmem:[%s1462_s14 + $0xa8] sm:$0xff] %v955_v54  ;;  %v852_v58 = vadd.f32 %v805_v56, %v546_v52  ;;  %v896_v59 = vmul.f32 %v1449_v41, %v860_v57  ;;  %v547_v2 = vpop.f32.mrf.mxu1 }
 0x149   : > { %v548_v63 = vadd.f32 %v547_v2, %v442_v1 }
 0x14a   : > { %v888_v60 = vmul.f32 %v1449_v41, %v852_v58  ;;  %v932_v61 = vadd.f32 %v1454_v44, %v896_v59 }
 0x14c   : > { %v924_v43 = vadd.f32 %v1454_v44, %v888_v60  ;;  %v964_v3 = vmax.f32 %v932_v61, 0.0 }
 0x14d   : > { %v827_v18 = vpop.f32.mrf.mxu3 }
 0x14e   : > { %v956_v4 = vmax.f32 %v924_v43, 0.0  ;;  %996 = vst [vmem:[%s1462_s14 + $0xf0] sm:$0xff] %v964_v3  ;;  %v861_v6 = vadd.f32 %v827_v18, %v568_v0 }
 0x14f   : > { %v807_v5 = vpop.f32.mrf.mxu2 }
 0x150   : > { %988 = vst [vmem:[%s1462_s14 + $0xb0] sm:$0xff] %v956_v4  ;;  %v853_v7 = vadd.f32 %v807_v5, %v548_v63  ;;  %v897_v10 = vmul.f32 %v1449_v41, %v861_v6 }
 0x152   : > { %v889_v12 = vmul.f32 %v1449_v41, %v853_v7  ;;  %v933_v13 = vadd.f32 %v1454_v44, %v897_v10 }
 0x154   : > { %v925_v14 = vadd.f32 %v1454_v44, %v889_v12  ;;  %v965_v53 = vmax.f32 %v933_v13, 0.0 }
 0x156   : > { %v957_v11 = vmax.f32 %v925_v14, 0.0  ;;  %997 = vst [vmem:[%s1462_s14 + $0xf8] sm:$0xff] %v965_v53 }
 0x158   : > { %989 = vst [vmem:[%s1462_s14 + $0xb8] sm:$0xff] %v957_v11 }
 0x159 PF: > { %s14_s15 = sadd.s32 1, %s1316_s15  }
 0x15a   : > { %p11_p4 = scmp.ge.s32.totalorder %s14_s15, 4  }
 0x15c   :  { %13 = sbr.rel (!%p11_p4) target bundleno = 1 (0x1), region = 68 }

</bundles_post_ra>
